<compile_context>
chip_gen: v5e
topology: v5e:2x2
jax: 0.10.0
libtpu: 0.0.40
codegen_flags: <defaults>
</compile_context>

<pallas_src>
import math

import jax
import jax.numpy as jnp
from jax.experimental import pallas as pl
from jax.experimental.pallas import tpu as pltpu

EPS = 1e-5


def _rup(x, m):
    return ((x + m - 1) // m) * m


def _pick_div(n, candidates):
    for t in candidates:
        if n % t == 0:
            return t
    return None


# ---------------------------------------------------------------------------
# Pallas kernels
# ---------------------------------------------------------------------------
def _make_mm_kernel(use_relu, has_res):
    """One-shot matmul (full K in the block) with fused epilogue:
       y = (A@B)*scale + shift (+residual) (+relu).  A/B bf16, accum f32."""
    def kernel(*refs):
        if has_res:
            a_ref, b_ref, s_ref, t_ref, r_ref, o_ref = refs
        else:
            a_ref, b_ref, s_ref, t_ref, o_ref = refs
        acc = jnp.dot(a_ref[...], b_ref[...],
                      preferred_element_type=jnp.float32)
        y = acc * s_ref[...] + t_ref[...]
        if has_res:
            y = y + r_ref[...].astype(jnp.float32)
        if use_relu:
            y = jnp.maximum(y, 0.0)
        o_ref[...] = y.astype(o_ref.dtype)
    return kernel


_MM_KERNELS = {(r, h): _make_mm_kernel(r, h)
               for r in (True, False) for h in (True, False)}


def _make_up_kernel(use_relu, has_res):
    """Fused nearest x2 upsample + per-channel affine (+relu), with the optional
       residual added AFTER the relu (matching `x + up2`).  The output is stored
       lane-dense as (1, th, 2, W, 2C) which is a free reshape of (2*th, 2W, C)."""
    def kernel(*refs):
        if has_res:
            x_ref, s_ref, t_ref, r_ref, o_ref = refs
        else:
            x_ref, s_ref, t_ref, o_ref = refs
        x = x_ref[0, :, :, :].astype(jnp.float32)          # (th, W, C)
        y = x * s_ref[...] + t_ref[...]
        if use_relu:
            y = jnp.maximum(y, 0.0)
        y2 = jnp.concatenate([y, y], axis=-1)              # (th, W, 2C): col duplicate
        if has_res:
            o_ref[0, :, 0, :, :] = (
                y2 + r_ref[0, :, 0, :, :].astype(jnp.float32)).astype(o_ref.dtype)
            o_ref[0, :, 1, :, :] = (
                y2 + r_ref[0, :, 1, :, :].astype(jnp.float32)).astype(o_ref.dtype)
        else:
            yc = y2.astype(o_ref.dtype)
            o_ref[0, :, 0, :, :] = yc                      # row duplicate
            o_ref[0, :, 1, :, :] = yc
    return kernel


_UP_KERNELS = {(r, h): _make_up_kernel(r, h)
               for r in (True, False) for h in (True, False)}


def _maxpool_kernel(a_ref, b_ref, o_ref):
    """3x3/s2/p1 max pool on row/col-pair packed input.
       a_ref: (1, th, 2, Wq, 2C) rows {2r, 2r+1}; b_ref: (1, 1, 1, Wq, 2C) is the
       first even row of the next row-block (supplies row 2r+2 at the edge)."""
    ow = o_ref.shape[2]
    C = o_ref.shape[3]
    a0 = a_ref[0, :, 0, :, :]                              # rows 2r
    a1 = a_ref[0, :, 1, :, :]                              # rows 2r+1
    a2 = jnp.concatenate([a_ref[0, 1:, 0, :, :], b_ref[0, :, 0, :, :]],
                         axis=0)                           # rows 2r+2
    v = jnp.maximum(jnp.maximum(a0, a1), a2)               # (th, Wq, 2C)
    h0 = v[:, :ow, :C]                                     # cols 2c
    h1 = v[:, :ow, C:]                                     # cols 2c+1
    h2 = v[:, 1:ow + 1, :C]                                # cols 2c+2
    o_ref[0, :, :, :] = jnp.maximum(jnp.maximum(h0, h1), h2).astype(o_ref.dtype)


def _avgpool_kernel(x_ref, o_ref):
    o_ref[...] = jnp.mean(x_ref[...].astype(jnp.float32), axis=1)


# ---------------------------------------------------------------------------
# Pallas wrappers
# ---------------------------------------------------------------------------
def fused_matmul_affine(a, b, scale, shift, residual=None, relu=True,
                        out_dtype=jnp.bfloat16):
    """(M,K)@(K,N) with fused per-column affine / residual / relu epilogue.
       Single K block (no reduction grid axis), bf16 operands, f32 accumulation."""
    M, K = a.shape
    _, N = b.shape
    a = a.astype(jnp.bfloat16)
    b = b.astype(jnp.bfloat16)
    if K % 8 != 0:                 # minimal K padding (only the 7x7x3 stem: 147->152)
        Kp = _rup(K, 8)
        a = jnp.pad(a, ((0, 0), (0, Kp - K)))
        b = jnp.pad(b, ((0, Kp - K), (0, 0)))
        K = Kp
    scale = scale.reshape(1, N).astype(jnp.float32)
    shift = shift.reshape(1, N).astype(jnp.float32)
    has_res = residual is not None

    if M <= 1024:
        tm = M
    else:
        tm = _pick_div(M, (1024, 896, 784, 768, 640, 512, 448, 392,
                           256, 128, 64, 32, 16, 8))
    if tm is None:                 # fallback (not hit by this network): pad M
        tm = 512
        Mp = _rup(M, tm)
        a = jnp.pad(a, ((0, Mp - M), (0, 0)))
        if has_res:
            residual = jnp.pad(residual, ((0, Mp - M), (0, 0)))
    else:
        Mp = M

    args = [a, b, scale, shift]
    in_specs = [pl.BlockSpec((tm, K), lambda i: (i, 0)),
                pl.BlockSpec((K, N), lambda i: (0, 0)),
                pl.BlockSpec((1, N), lambda i: (0, 0)),
                pl.BlockSpec((1, N), lambda i: (0, 0))]
    if has_res:
        args.append(residual)
        in_specs.append(pl.BlockSpec((tm, N), lambda i: (i, 0)))

    out = pl.pallas_call(
        _MM_KERNELS[(relu, has_res)],
        out_shape=jax.ShapeDtypeStruct((Mp, N), out_dtype),
        grid=(Mp // tm,),
        in_specs=in_specs,
        out_specs=pl.BlockSpec((tm, N), lambda i: (i, 0)),
        compiler_params=pltpu.CompilerParams(
            dimension_semantics=("parallel",),
            vmem_limit_bytes=32 * 1024 * 1024),
    )(*args)
    return out[:M] if Mp != M else out


def upsample2x_affine(x, scale, shift, relu=True, residual=None):
    """Fused nn.Upsample(scale_factor=2, 'nearest') + BN affine + ReLU,
       optionally followed by `residual + result` (the hourglass `x + up2`)."""
    N, H, W, C = x.shape
    s = scale.reshape(1, C).astype(jnp.float32)
    t = shift.reshape(1, C).astype(jnp.float32)
    th = _pick_div(H, (16, 14, 8, 7, 4, 2, 1))
    grid = (N, H // th)
    args = [x, s, t]
    in_specs = [pl.BlockSpec((1, th, W, C), lambda n, i: (n, i, 0, 0)),
                pl.BlockSpec((1, C), lambda n, i: (0, 0)),
                pl.BlockSpec((1, C), lambda n, i: (0, 0))]
    has_res = residual is not None
    if has_res:
        args.append(residual.reshape(N, H, 2, W, 2 * C))   # free reshape
        in_specs.append(
            pl.BlockSpec((1, th, 2, W, 2 * C), lambda n, i: (n, i, 0, 0, 0)))
    out = pl.pallas_call(
        _UP_KERNELS[(relu, has_res)],
        out_shape=jax.ShapeDtypeStruct((N, H, 2, W, 2 * C), jnp.bfloat16),
        grid=grid,
        in_specs=in_specs,
        out_specs=pl.BlockSpec((1, th, 2, W, 2 * C), lambda n, i: (n, i, 0, 0, 0)),
        compiler_params=pltpu.CompilerParams(
            dimension_semantics=("parallel", "parallel")),
    )(*args)
    return out.reshape(N, 2 * H, 2 * W, C)


def maxpool_3x3_s2_p1(x):
    """nn.MaxPool2d(kernel_size=3, stride=2, padding=1) on NHWC.  The padded map
       is repacked (free reshape) into row pairs and lane-dense column pairs so the
       kernel reads the input exactly once (no 9x HBM stack)."""
    N, H, W, C = x.shape
    oh = (H + 2 - 3) // 2 + 1
    ow = (W + 2 - 3) // 2 + 1
    Hq, Wq = oh + 1, ow + 1
    xp = jnp.pad(x, ((0, 0), (1, 2 * Hq - H - 1), (1, 2 * Wq - W - 1), (0, 0)),
                 constant_values=-jnp.inf)
    xr = xp.reshape(N, Hq, 2, Wq, 2 * C)                   # free reshape
    th = _pick_div(oh, (8, 7, 4, 2, 1))
    out = pl.pallas_call(
        _maxpool_kernel,
        out_shape=jax.ShapeDtypeStruct((N, oh, ow, C), x.dtype),
        grid=(N, oh // th),
        in_specs=[
            pl.BlockSpec((1, th, 2, Wq, 2 * C), lambda n, i: (n, i, 0, 0, 0)),
            pl.BlockSpec((1, 1, 1, Wq, 2 * C),
                         lambda n, i: (n, (i + 1) * th, 0, 0, 0)),
        ],
        out_specs=pl.BlockSpec((1, th, ow, C), lambda n, i: (n, i, 0, 0)),
        compiler_params=pltpu.CompilerParams(
            dimension_semantics=("parallel", "parallel")),
    )(xr, xr)
    return out


def avgpool_full(x):
    """nn.AvgPool2d(H, stride=1) on an HxH feature map -> (N, C) in f32."""
    N, H, W, C = x.shape
    x2 = x.reshape(N, H * W, C)
    return pl.pallas_call(
        _avgpool_kernel,
        out_shape=jax.ShapeDtypeStruct((N, C), jnp.float32),
        grid=(1,),
        in_specs=[pl.BlockSpec((N, H * W, C), lambda i: (0, 0, 0))],
        out_specs=pl.BlockSpec((N, C), lambda i: (0, 0)),
        compiler_params=pltpu.CompilerParams(dimension_semantics=("arbitrary",)),
    )(x2)


# ---------------------------------------------------------------------------
# Glue: im2col convolution + network forward
# ---------------------------------------------------------------------------
def im2col(x, kh, kw, stride, pad):
    N, H, W, C = x.shape
    xp = jnp.pad(x, ((0, 0), (pad, pad), (pad, pad), (0, 0)))
    Hp, Wp = H + 2 * pad, W + 2 * pad
    oh = (Hp - kh) // stride + 1
    ow = (Wp - kw) // stride + 1
    cols = []
    for i in range(kh):
        for j in range(kw):
            cols.append(xp[:, i:i + stride * (oh - 1) + 1:stride,
                           j:j + stride * (ow - 1) + 1:stride, :])
    patches = jnp.concatenate(cols, axis=-1)       # (N, oh, ow, kh*kw*C)
    return patches.reshape(N * oh * ow, kh * kw * C), (N, oh, ow)


def conv_bn_act(x, w, scale, shift, stride=1, pad=0, residual=None, relu=True):
    kh, kw, cin, cout = w.shape
    cols, (N, oh, ow) = im2col(x.astype(jnp.bfloat16), kh, kw, stride, pad)
    res2d = None if residual is None else residual.reshape(-1, cout)
    y = fused_matmul_affine(cols, w.reshape(kh * kw * cin, cout),
                            scale, shift, residual=res2d, relu=relu)
    return y.reshape(N, oh, ow, cout)


def basic_block_fwd(x, p):
    s = p['stride']
    out = conv_bn_act(x, p['conv1_w'], *p['bn1'], stride=s, pad=1, relu=True)
    if p['downsample'] is not None:
        d = p['downsample']
        residual = conv_bn_act(x, d['w'], *d['bn'], stride=s, pad=0, relu=False)
    else:
        residual = x
    out = conv_bn_act(out, p['conv2_w'], *p['bn2'], stride=1, pad=1,
                      residual=residual, relu=True)
    return out


def resnet_block_fwd(x, p):
    for name in ('layer1', 'layer2', 'layer3'):
        for blk in p[name]:
            x = basic_block_fwd(x, blk)
    return x


def hour_glass_fwd(x, p, use_detect=False):
    up0 = resnet_block_fwd(x, p['rb'])                       # (N,14,14,256)
    ones64 = jnp.ones((64,), jnp.float32)
    compress = conv_bn_act(up0, p['conv1_w'], ones64, p['conv1_b'],
                           stride=1, pad=0, relu=True)       # conv1x1 + bias + relu
    u = upsample2x_affine(compress, *p['up0_bn'], relu=True)            # x2
    out = upsample2x_affine(u, *p['up1_bn'], relu=True, residual=x)     # x2, + x
    if use_detect:
        return out, up0
    return out


def faster_attention_fwd(params, x, gts):
    # stem
    x = conv_bn_act(x, params['conv1_w'], *params['bn1'],
                    stride=2, pad=3, relu=True)
    x = maxpool_3x3_s2_p1(x)
    # hour glass 1 (+ box head)
    x, temp_box = hour_glass_fwd(x, params['hg1'], use_detect=True)
    pb = temp_box
    for blk in params['box_conv']:
        pb = basic_block_fwd(pb, blk)
    pb = avgpool_full(pb)                                    # (N, 512)
    bw, bb = params['box_fc']
    pred_box = fused_matmul_affine(pb, bw, jnp.ones((4,), jnp.float32), bb,
                                   relu=False, out_dtype=jnp.float32)
    # center of gt boxes (only used when attention=True; default is False)
    _center = [[gt[0] + gt[2] / 2.0, gt[1] + gt[3] / 2.0] for gt in gts]
    # hour glass 2 + trunk + classifier head
    x = hour_glass_fwd(x, params['hg2'], use_detect=False)
    x = resnet_block_fwd(x, params['rb'])
    for blk in params['layer4']:
        x = basic_block_fwd(x, blk)
    x = avgpool_full(x)                                      # (N, 512)
    fw, fb = params['fc']
    pred_cls = fused_matmul_affine(x, fw, jnp.ones((2,), jnp.float32), fb,
                                   relu=False, out_dtype=jnp.float32)
    return pred_cls, pred_box


# ---------------------------------------------------------------------------
# Deterministic parameter construction (mirrors the module's __init__)
# ---------------------------------------------------------------------------
class KeyGen:
    def __init__(self, key):
        self._key = key

    def __call__(self):
        self._key, sub = jax.random.split(self._key)
        return sub


def conv_weight(kg, kh, kw, cin, cout):
    # kaiming_normal_(mode='fan_out', nonlinearity='relu')
    std = math.sqrt(2.0 / (cout * kh * kw))
    return std * jax.random.normal(kg(), (kh, kw, cin, cout), jnp.float32)


def conv_bias(kg, kh, kw, cin, cout):
    bound = 1.0 / math.sqrt(cin * kh * kw)
    return jax.random.uniform(kg(), (cout,), jnp.float32, -bound, bound)


def bn_affine(c):
    # eval-mode BatchNorm2d with gamma=1, beta=0, running_mean=0, running_var=1
    gamma = jnp.ones((c,), jnp.float32)
    beta = jnp.zeros((c,), jnp.float32)
    mean = jnp.zeros((c,), jnp.float32)
    var = jnp.ones((c,), jnp.float32)
    scale = gamma / jnp.sqrt(var + EPS)
    shift = beta - mean * scale
    return scale, shift


def linear_params(kg, cin, cout):
    bound = 1.0 / math.sqrt(cin)
    w = jax.random.uniform(kg(), (cin, cout), jnp.float32, -bound, bound)
    b = jax.random.uniform(kg(), (cout,), jnp.float32, -bound, bound)
    return w, b


def make_layer_params(kg, inplanes, planes, blocks, stride=1):
    layer = []
    for i in range(blocks):
        s = stride if i == 0 else 1
        cin = inplanes if i == 0 else planes
        blk = {
            'stride': s,
            'conv1_w': conv_weight(kg, 3, 3, cin, planes),
            'bn1': bn_affine(planes),
            'conv2_w': conv_weight(kg, 3, 3, planes, planes),
            'bn2': bn_affine(planes),
            'downsample': None,
        }
        if i == 0 and (stride != 1 or inplanes != planes):
            blk['downsample'] = {'w': conv_weight(kg, 1, 1, inplanes, planes),
                                 'bn': bn_affine(planes)}
        layer.append(blk)
    return layer


def resnet_block_params(kg, layers):
    return {
        'layer1': make_layer_params(kg, 64, 64, layers[0], 1),
        'layer2': make_layer_params(kg, 64, 128, layers[1], 2),
        'layer3': make_layer_params(kg, 128, 256, layers[2], 2),
    }


def hour_glass_params(kg):
    return {
        'rb': resnet_block_params(kg, [2, 2, 2]),
        'conv1_w': conv_weight(kg, 1, 1, 256, 64),
        'conv1_b': conv_bias(kg, 1, 1, 256, 64),
        'up0_bn': bn_affine(64),
        'up1_bn': bn_affine(64),
    }


def faster_attention_params(kg, layers):
    return {
        'conv1_w': conv_weight(kg, 7, 7, 3, 64),
        'bn1': bn_affine(64),
        'rb': resnet_block_params(kg, layers),
        'layer4': make_layer_params(kg, 256, 512, layers[2], 2),
        'fc': linear_params(kg, 512, 2),
        'hg1': hour_glass_params(kg),
        'hg2': hour_glass_params(kg),
        'box_conv': make_layer_params(kg, 256, 512, layers[2], 2),
        'box_fc': linear_params(kg, 512, 4),
    }


# ---------------------------------------------------------------------------
if __name__ == "__main__":
    root = jax.random.PRNGKey(0)
    pkey, xkey = jax.random.split(root)

    layers = [1, 1, 1]   # Faster_Attention(BasicBlock, layers=[1,1,1])
    params = faster_attention_params(KeyGen(pkey), layers)

    # 224x224 input is required so the final feature map is 7x7 (AvgPool2d(7)
    # -> 512 features feeding the nn.Linear(512, .) heads).
    x_nchw = jax.random.normal(xkey, (1, 3, 224, 224), jnp.float32)
    x = jnp.transpose(x_nchw, (0, 2, 3, 1))        # NCHW -> NHWC
    gts = [[10.0, 20.0, 60.0, 80.0]]               # [x, y, w, h] per batch elem

    pred_cls, pred_box = faster_attention_fwd(params, x, gts)
    jax.block_until_ready((pred_cls, pred_box))

    assert pred_cls.shape == (1, 2), pred_cls.shape
    assert pred_box.shape == (1, 4), pred_box.shape
    assert bool(jnp.all(jnp.isfinite(pred_cls)))
    assert bool(jnp.all(jnp.isfinite(pred_box)))
    print("KERNEL_OK")
</pallas_src>

<mosaic_0001>
module attributes {stable_mosaic.version = 11 : i64} {
  func.func @kernel(%arg0: i32, %arg1: memref<896x152xbf16, #tpu.memory_space<vmem>>, %arg2: memref<152x64xbf16, #tpu.memory_space<vmem>>, %arg3: memref<1x64xf32, #tpu.memory_space<vmem>>, %arg4: memref<1x64xf32, #tpu.memory_space<vmem>>, %arg5: memref<896x64xbf16, #tpu.memory_space<vmem>>) attributes {dimension_semantics = [#tpu.dimension_semantics<parallel>], iteration_bounds = array<i64: 14>, scalar_prefetch = 0 : i64, scratch_operands = 0 : i64, tpu.core_type = #tpu.core_type<tc>, window_params = [{transform_indices = @transform_0, window_bounds = array<i64: 896, 152>}, {pipeline_mode = #tpu.pipeline_mode<synchronous>, transform_indices = @transform_1, window_bounds = array<i64: 152, 64>}, {pipeline_mode = #tpu.pipeline_mode<synchronous>, transform_indices = @transform_2, window_bounds = array<i64: 1, 64>}, {pipeline_mode = #tpu.pipeline_mode<synchronous>, transform_indices = @transform_3, window_bounds = array<i64: 1, 64>}, {transform_indices = @transform_4, window_bounds = array<i64: 896, 64>}]} {
    %c0 = arith.constant 0 : index
    %c0_0 = arith.constant 0 : index
    %0 = vector.load %arg1[%c0, %c0_0] : memref<896x152xbf16, #tpu.memory_space<vmem>>, vector<896x152xbf16>
    %c0_1 = arith.constant 0 : index
    %c0_2 = arith.constant 0 : index
    %1 = vector.load %arg2[%c0_1, %c0_2] : memref<152x64xbf16, #tpu.memory_space<vmem>>, vector<152x64xbf16>
    %cst = arith.constant dense<0.000000e+00> : vector<896x64xf32>
    %2 = tpu.matmul %0, %1, %cst {dimension_numbers = #tpu.dot_dimension_numbers<[1], [0], [0], [1], [0, 0, 1, 1], [], []>} : vector<896x152xbf16>, vector<152x64xbf16>, vector<896x64xf32> -> vector<896x64xf32>
    %c0_3 = arith.constant 0 : index
    %c0_4 = arith.constant 0 : index
    %3 = vector.load %arg3[%c0_3, %c0_4] : memref<1x64xf32, #tpu.memory_space<vmem>>, vector<1x64xf32>
    %4 = vector.broadcast %3 : vector<1x64xf32> to vector<896x64xf32>
    %5 = arith.mulf %2, %4 : vector<896x64xf32>
    %c0_5 = arith.constant 0 : index
    %c0_6 = arith.constant 0 : index
    %6 = vector.load %arg4[%c0_5, %c0_6] : memref<1x64xf32, #tpu.memory_space<vmem>>, vector<1x64xf32>
    %7 = vector.broadcast %6 : vector<1x64xf32> to vector<896x64xf32>
    %8 = arith.addf %5, %7 : vector<896x64xf32>
    %cst_7 = arith.constant 0.000000e+00 : f32
    %9 = vector.broadcast %cst_7 : f32 to vector<896x64xf32>
    %10 = arith.maximumf %8, %9 : vector<896x64xf32>
    %11 = arith.truncf %10 : vector<896x64xf32> to vector<896x64xbf16>
    %c0_8 = arith.constant 0 : index
    %c0_9 = arith.constant 0 : index
    %12 = vector.load %arg5[%c0_8, %c0_9] : memref<896x64xbf16, #tpu.memory_space<vmem>>, vector<896x64xbf16>
    tpu.vector_store %arg5[%c0_8, %c0_9], %11 {strides = array<i32>} : memref<896x64xbf16, #tpu.memory_space<vmem>>, vector<896x64xbf16>,
    return
  }
  func.func @transform_0(%arg0: i32) -> (i32, i32) {
    %c0_i32 = arith.constant 0 : i32
    %c0_i32_0 = arith.constant 0 : i32
    return %arg0, %c0_i32 : i32, i32
  }
  func.func @transform_1(%arg0: i32) -> (i32, i32) {
    %c0_i32 = arith.constant 0 : i32
    %c0_i32_0 = arith.constant 0 : i32
    %c0_i32_1 = arith.constant 0 : i32
    return %c0_i32, %c0_i32_0 : i32, i32
  }
  func.func @transform_2(%arg0: i32) -> (i32, i32) {
    %c0_i32 = arith.constant 0 : i32
    %c0_i32_0 = arith.constant 0 : i32
    %c0_i32_1 = arith.constant 0 : i32
    return %c0_i32, %c0_i32_0 : i32, i32
  }
  func.func @transform_3(%arg0: i32) -> (i32, i32) {
    %c0_i32 = arith.constant 0 : i32
    %c0_i32_0 = arith.constant 0 : i32
    %c0_i32_1 = arith.constant 0 : i32
    return %c0_i32, %c0_i32_0 : i32, i32
  }
  func.func @transform_4(%arg0: i32) -> (i32, i32) {
    %c0_i32 = arith.constant 0 : i32
    %c0_i32_0 = arith.constant 0 : i32
    return %arg0, %c0_i32 : i32, i32
  }
}

</mosaic_0001>

<bundles_post_ra>
// kernel: tpu_custom_call.1
= control target key start
LH: loop header
LB: loop body
LE: loop exit
PB: predicated region body
PF: predicated region fallthrough
CT: control target
= control target key end

     0   :  { %s3002_s15 = smov 0   ;;  %s3983_s0 = inlined_call_operand.vmem [shape: bf16[12544,152], index: 0, kind: input, shape index: {}]   ;;  %s3984_s1 = inlined_call_operand.vmem [shape: bf16[152,64], index: 1, kind: input, shape index: {}]   ;;  %s3985_s2 = inlined_call_operand.vmem [shape: f32[1,64], index: 2, kind: input, shape index: {}]   ;;  %s3986_s3 = inlined_call_operand.vmem [shape: f32[1,64], index: 3, kind: input, shape index: {}]   ;;  %s3987_s4 = inlined_call_operand.vmem [shape: bf16[12544,64], index: 4, kind: output, shape index: {}]  }
   0x1 LB: > { %s2273_s16 = sadd.s32 4294967295, %s2975_s15   ;;  %p2277_p0 = scmp.ge.s32.totalorder %s2975_s15, 1  ;;  %s2975_s15 = sphi %s3002_s15, %s14_s15  }
   0x2   : > { %p164_p1 = scmp.lt.s32.totalorder %s2975_s15, 15 }
   0x4   : > { %p165_p2 = pnand %p2277_p0, %p164_p1 }
   0x5   : > { %s191_s21 = smul.u32 (!%p165_p2), 112, %s2273_s16 }
   0x6   : > { %168 = sbr.rel (%p165_p2) target bundleno = 627 (0x273), region = 36 }
   0x7   : > { %p192_p3 = scmp.lt.s32.totalorder (!%p165_p2), %s191_s21, 1567 }
   0xb   : > { %v2943_v0 = vld [vmem:[%s3984_s1 + $0x38] sm:$0xff]  ;;  %v335_v1 = vld [vmem:[%s3984_s1 + $0x48] sm:$0xf]  ;;  %vm1066_vm0 = vcmask 1043456   ;;  %v2942_v3 = vld [vmem:[%s3984_s1 + $0x30] sm:$0xff]  ;;  %s3989_s21 = smov (!%p192_p3, %s191_s21), 1567 }
   0xc   : > { %v877_v2 = vunpack.c.l.b16 %v335_v1  ;;  %1070 = vmatpush.bf16.msra.mxu0 %v2943_v0  ;;  %2945 = vmatpush.bf16.msra.mxu2 %v2943_v0  ;;  %v2944_v6 = vld [vmem:[%s3984_s1 + $0x40] sm:$0xff]  ;;  %v2941_v7 = vld [vmem:[%s3984_s1 + $0x28] sm:$0xff]  ;;  %s2823_s28 = sshll.u32 %s3989_s21, 3  ;;  %vm897_vm1 = vcmask 195584   ;;  %v2939_v15 = vld [vmem:[%s3984_s1 + $0x18] sm:$0xff]  ;;  %s2280_s22 = sshll.u32 %s3989_s21, 2 }
   0xd   : > { %s3031_s5 = scalar_lea.vmem %s3983_s0, %s2823_s28  ;;  %v2940_v11 = vld [vmem:[%s3984_s1 + $0x20] sm:$0xff]  ;;  %v2938_v16 = vld [vmem:[%s3984_s1 + $0x10] sm:$0xff]  ;;  %v2937_v17 = vld [vmem:[%s3984_s1 + $0x8] sm:$0xff]  ;;  %s3168_s25 = scalar_lea.vmem %s3987_s4, %s2280_s22  ;;  %vm2104_vm2 = vcmask 519168  }
   0xe   : > { %v887_v4 = vpack.c.b16 %v877_v2, %v877_v2  ;;  %v2824_v8 = vld [vmem:[%s3031_s5 + $0x4] sm:$0xf]  ;;  %v2285_v9 = vld [vmem:[%s3031_s5 + $0x8] sm:$0xf0]  ;;  %v2882_v12 = vld [vmem:[%s3031_s5 + $0x1d4] sm:$0xf] }
   0xf   : > { %v2288_v10 = vor.u32 %v2824_v8, %v2285_v9  ;;  %v2517_v13 = vld [vmem:[%s3031_s5 + $0x1d8] sm:$0xf0]  ;;  %v2826_v18 = vld [vmem:[%s3031_s5 + $0x14] sm:$0xf]  ;;  %v2884_v20 = vld [vmem:[%s3031_s5 + $0x1e4] sm:$0xf] }
  0x10   : > { %v1068_v5 = vsel %vm1066_vm0, %v887_v4, 0  ;;  %1071 = vmatpush.bf16.msra.mxu0 %v2942_v3  ;;  %2946 = vmatpush.bf16.msra.mxu2 %v2942_v3  ;;  %v2520_v14 = vor.u32 %v2882_v12, %v2517_v13  ;;  %v2293_v19 = vld [vmem:[%s3031_s5 + $0x18] sm:$0xf0]  ;;  %v2525_v21 = vld [vmem:[%s3031_s5 + $0x1e8] sm:$0xf0]  ;;  %v2936_v23 = vld [vmem:[%s3984_s1] sm:$0xff] }
  0x11   : > { %1365 = vmatpush.bf16.msra.mxu1 %v1068_v5  ;;  %2953 = vmatpush.bf16.msra.mxu3 %v1068_v5  ;;  %v2296_v22 = vor.u32 %v2826_v18, %v2293_v19  ;;  %v2283_v24 = vld [vmem:[%s3031_s5] sm:$0xf]  ;;  %v2825_v25 = vld [vmem:[%s3031_s5 + $0x4] sm:$0xf0]  ;;  %v2528_v26 = vor.u32 %v2884_v20, %v2525_v21  ;;  %v2828_v31 = vld [vmem:[%s3031_s5 + $0x24] sm:$0xf] }
  0x12   : > { %v2507_v27 = vld [vmem:[%s3031_s5 + $0x1c0] sm:$0xf]  ;;  %v2881_v28 = vld [vmem:[%s3031_s5 + $0x1c4] sm:$0xf0]  ;;  %v2284_v29 = vor.u32 %v2825_v25, %v2283_v24  ;;  %v2301_v32 = vld [vmem:[%s3031_s5 + $0x28] sm:$0xf0] }
  0x13   : > { %v2508_v30 = vor.u32 %v2881_v28, %v2507_v27  ;;  %v2886_v33 = vld [vmem:[%s3031_s5 + $0x1f4] sm:$0xf]  ;;  %v2533_v34 = vld [vmem:[%s3031_s5 + $0x1f8] sm:$0xf0]  ;;  %v2304_v35 = vor.u32 %v2828_v31, %v2301_v32  ;;  %v2291_v36 = vld [vmem:[%s3031_s5 + $0x10] sm:$0xf] }
  0x14   : > { %1072 = vmatpush.bf16.msra.mxu0 %v2941_v7  ;;  %2947 = vmatpush.bf16.msra.mxu2 %v2941_v7  ;;  %v2827_v37 = vld [vmem:[%s3031_s5 + $0x14] sm:$0xf0]  ;;  %v2536_v38 = vor.u32 %v2886_v33, %v2533_v34  ;;  %v2515_v39 = vld [vmem:[%s3031_s5 + $0x1d0] sm:$0xf]  ;;  %v2830_v43 = vld [vmem:[%s3031_s5 + $0x34] sm:$0xf] }
  0x15   : > { %1366 = vmatpush.bf16.msra.mxu1 %v2944_v6  ;;  %2954 = vmatpush.bf16.msra.mxu3 %v2944_v6  ;;  %v2883_v40 = vld [vmem:[%s3031_s5 + $0x1d4] sm:$0xf0]  ;;  %v2292_v41 = vor.u32 %v2827_v37, %v2291_v36  ;;  %v2309_v44 = vld [vmem:[%s3031_s5 + $0x38] sm:$0xf0]  ;;  %v2888_v45 = vld [vmem:[%s3031_s5 + $0x204] sm:$0xf] }
  0x16   : > { %v2516_v42 = vor.u32 %v2883_v40, %v2515_v39  ;;  %v2541_v46 = vld [vmem:[%s3031_s5 + $0x208] sm:$0xf0]  ;;  %v2312_v47 = vor.u32 %v2830_v43, %v2309_v44  ;;  %v2299_v48 = vld [vmem:[%s3031_s5 + $0x20] sm:$0xf]  ;;  %v2829_v49 = vld [vmem:[%s3031_s5 + $0x24] sm:$0xf0] }
  0x17   : > { %v2544_v50 = vor.u32 %v2888_v45, %v2541_v46  ;;  %v2523_v51 = vld [vmem:[%s3031_s5 + $0x1e0] sm:$0xf]  ;;  %v2885_v52 = vld [vmem:[%s3031_s5 + $0x1e4] sm:$0xf0]  ;;  %v2300_v53 = vor.u32 %v2829_v49, %v2299_v48  ;;  %v2832_v55 = vld [vmem:[%s3031_s5 + $0x44] sm:$0xf] }
  0x18   : > { %2765 = vmatmul.msk.bf16.vlgmr.msra.gmra.mxu1 %vm897_vm1, %v2288_v10  ;;  %1073 = vmatpush.bf16.msra.mxu0 %v2940_v11  ;;  %v2524_v54 = vor.u32 %v2885_v52, %v2523_v51  ;;  %v2317_v56 = vld [vmem:[%s3031_s5 + $0x48] sm:$0xf0]  ;;  %v2890_v57 = vld [vmem:[%s3031_s5 + $0x214] sm:$0xf]  ;;  %v2549_v58 = vld [vmem:[%s3031_s5 + $0x218] sm:$0xf0] }
  0x19   : > { %2794 = vmatmul.msk.bf16.vlgmr.msra.gmra.mxu3 %vm897_vm1, %v2520_v14  ;;  %2948 = vmatpush.bf16.msra.mxu2 %v2940_v11  ;;  %v2320_v59 = vor.u32 %v2832_v55, %v2317_v56  ;;  %v2307_v60 = vld [vmem:[%s3031_s5 + $0x30] sm:$0xf]  ;;  %v2831_v61 = vld [vmem:[%s3031_s5 + $0x34] sm:$0xf0]  ;;  %v2552_v62 = vor.u32 %v2890_v57, %v2549_v58  ;;  %v2834_v3 = vld [vmem:[%s3031_s5 + $0x54] sm:$0xf] }
  0x1a   : > { %v2531_v63 = vld [vmem:[%s3031_s5 + $0x1f0] sm:$0xf]  ;;  %v2887_v0 = vld [vmem:[%s3031_s5 + $0x1f4] sm:$0xf0]  ;;  %v2308_v1 = vor.u32 %v2831_v61, %v2307_v60  ;;  %v2325_v4 = vld [vmem:[%s3031_s5 + $0x58] sm:$0xf0] }
  0x1b   : > { %v2532_v2 = vor.u32 %v2887_v0, %v2531_v63  ;;  %v2892_v5 = vld [vmem:[%s3031_s5 + $0x224] sm:$0xf]  ;;  %v2557_v6 = vld [vmem:[%s3031_s5 + $0x228] sm:$0xf0]  ;;  %v2328_v7 = vor.u32 %v2834_v3, %v2325_v4  ;;  %v2315_v8 = vld [vmem:[%s3031_s5 + $0x40] sm:$0xf] }
  0x1c   : > { %1074 = vmatpush.bf16.msra.mxu0 %v2939_v15  ;;  %v2833_v9 = vld [vmem:[%s3031_s5 + $0x44] sm:$0xf0]  ;;  %v2560_v10 = vor.u32 %v2892_v5, %v2557_v6  ;;  %v2539_v11 = vld [vmem:[%s3031_s5 + $0x200] sm:$0xf]  ;;  %v2565_v18 = vld [vmem:[%s3031_s5 + $0x238] sm:$0xf0] }
  0x1d   : > { %2949 = vmatpush.bf16.msra.mxu2 %v2939_v15  ;;  %v2889_v12 = vld [vmem:[%s3031_s5 + $0x204] sm:$0xf0]  ;;  %v2316_v13 = vor.u32 %v2833_v9, %v2315_v8  ;;  %v2836_v15 = vld [vmem:[%s3031_s5 + $0x64] sm:$0xf]  ;;  %v2323_v20 = vld [vmem:[%s3031_s5 + $0x50] sm:$0xf] }
  0x1e   : > { %v2540_v14 = vor.u32 %v2889_v12, %v2539_v11  ;;  %v2835_v21 = vld [vmem:[%s3031_s5 + $0x54] sm:$0xf0]  ;;  %v2838_v27 = vld [vmem:[%s3031_s5 + $0x74] sm:$0xf]  ;;  %v2341_v28 = vld [vmem:[%s3031_s5 + $0x78] sm:$0xf0] }
  0x1f   : > { %v2891_v24 = vld [vmem:[%s3031_s5 + $0x214] sm:$0xf0]  ;;  %v2324_v25 = vor.u32 %v2835_v21, %v2323_v20  ;;  %v2344_v31 = vor.u32 %v2838_v27, %v2341_v28  ;;  %v2331_v32 = vld [vmem:[%s3031_s5 + $0x60] sm:$0xf]  ;;  %v2837_v33 = vld [vmem:[%s3031_s5 + $0x64] sm:$0xf0] }
  0x20   : > { %1075 = vmatpush.bf16.msra.mxu0 %v2938_v16  ;;  %v2893_v36 = vld [vmem:[%s3031_s5 + $0x224] sm:$0xf0]  ;;  %v2332_v37 = vor.u32 %v2837_v33, %v2331_v32  ;;  %v2840_v39 = vld [vmem:[%s3031_s5 + $0x84] sm:$0xf]  ;;  %v2349_v40 = vld [vmem:[%s3031_s5 + $0x88] sm:$0xf0] }
  0x21   : > { %2950 = vmatpush.bf16.msra.mxu2 %v2938_v16  ;;  %v2333_v16 = vld [vmem:[%s3031_s5 + $0x68] sm:$0xf0]  ;;  %v2352_v43 = vor.u32 %v2840_v39, %v2349_v40  ;;  %v2339_v45 = vld [vmem:[%s3031_s5 + $0x70] sm:$0xf]  ;;  %v2839_v46 = vld [vmem:[%s3031_s5 + $0x74] sm:$0xf0] }
  0x22   : > { %v2336_v19 = vor.u32 %v2836_v15, %v2333_v16  ;;  %v2563_v48 = vld [vmem:[%s3031_s5 + $0x230] sm:$0xf]  ;;  %v2895_v49 = vld [vmem:[%s3031_s5 + $0x234] sm:$0xf0]  ;;  %v2357_v55 = vld [vmem:[%s3031_s5 + $0x98] sm:$0xf0] }
  0x23   : > { %v2564_v51 = vor.u32 %v2895_v49, %v2563_v48  ;;  %v2900_v56 = vld [vmem:[%s3031_s5 + $0x264] sm:$0xf]  ;;  %v2589_v57 = vld [vmem:[%s3031_s5 + $0x268] sm:$0xf0]  ;;  %v2347_v61 = vld [vmem:[%s3031_s5 + $0x80] sm:$0xf] }
  0x24   : > { %1076 = vmatpush.bf16.msra.mxu0 %v2937_v17  ;;  %v2592_v63 = vor.u32 %v2900_v56, %v2589_v57  ;;  %v2571_v0 = vld [vmem:[%s3031_s5 + $0x240] sm:$0xf]  ;;  %v2844_v15 = vld [vmem:[%s3031_s5 + $0xa4] sm:$0xf]  ;;  %v2365_v16 = vld [vmem:[%s3031_s5 + $0xa8] sm:$0xf0] }
  0x25   : > { %2951 = vmatpush.bf16.msra.mxu2 %v2937_v17  ;;  %v2894_v17 = vld [vmem:[%s3031_s5 + $0x234] sm:$0xf]  ;;  %v2597_v20 = vld [vmem:[%s3031_s5 + $0x278] sm:$0xf0] }
  0x28   : > { %2766 = vmatmul.msk.bf16.gmra.mxu1 %vm897_vm1, %v2296_v22  ;;  %1077 = vmatpush.bf16.msra.mxu0 %v2936_v23  ;;  %v2568_v22 = vor.u32 %v2894_v17, %v2565_v18 }
  0x29   : > { %2795 = vmatmul.msk.bf16.gmra.mxu3 %vm897_vm1, %v2528_v26  ;;  %2952 = vmatpush.bf16.msra.mxu2 %v2936_v23  ;;  %v2547_v23 = vld [vmem:[%s3031_s5 + $0x210] sm:$0xf] }
  0x2a   : > { %v2548_v26 = vor.u32 %v2891_v24, %v2547_v23 }
  0x2b   : > { %1078 = vmatmul.bf16.vlgmr.msra.gmra.mxu0 %v2284_v29  ;;  %v2896_v29 = vld [vmem:[%s3031_s5 + $0x244] sm:$0xf] }
  0x2c   : > { %1218 = vmatmul.bf16.vlgmr.msra.gmra.mxu2 %v2508_v30  ;;  %v2573_v30 = vld [vmem:[%s3031_s5 + $0x248] sm:$0xf0] }
  0x2d   : > { %v2576_v34 = vor.u32 %v2896_v29, %v2573_v30  ;;  %v2579_v29 = vld [vmem:[%s3031_s5 + $0x250] sm:$0xf]  ;;  %v2899_v30 = vld [vmem:[%s3031_s5 + $0x254] sm:$0xf0] }
  0x38   : > { %2767 = vmatmul.msk.bf16.gmra.mxu1 %vm897_vm1, %v2304_v35  ;;  %v2555_v35 = vld [vmem:[%s3031_s5 + $0x220] sm:$0xf] }
  0x39   : > { %2796 = vmatmul.msk.bf16.gmra.mxu3 %vm897_vm1, %v2536_v38  ;;  %v2556_v38 = vor.u32 %v2893_v36, %v2555_v35  ;;  %v2580_v35 = vor.u32 %v2899_v30, %v2579_v29 }
  0x3b   : > { %1083 = vmatmul.bf16.gmra.mxu0 %v2292_v41  ;;  %v2898_v41 = vld [vmem:[%s3031_s5 + $0x254] sm:$0xf] }
  0x3c   : > { %1223 = vmatmul.bf16.gmra.mxu2 %v2516_v42  ;;  %v2581_v42 = vld [vmem:[%s3031_s5 + $0x258] sm:$0xf0] }
  0x48   : > { %2768 = vmatmul.msk.bf16.gmra.mxu1 %vm897_vm1, %v2312_v47  ;;  %v2584_v47 = vor.u32 %v2898_v41, %v2581_v42 }
  0x49   : > { %2797 = vmatmul.msk.bf16.gmra.mxu3 %vm897_vm1, %v2544_v50  ;;  %v2340_v50 = vor.u32 %v2839_v46, %v2339_v45  ;;  %v2846_v46 = vld [vmem:[%s3031_s5 + $0xb4] sm:$0xf] }
  0x4b   : > { %1088 = vmatmul.bf16.gmra.mxu0 %v2300_v53 }
  0x4c   : > { %1228 = vmatmul.bf16.gmra.mxu2 %v2524_v54  ;;  %v2842_v54 = vld [vmem:[%s3031_s5 + $0x94] sm:$0xf] }
  0x4d   : > { %v2360_v58 = vor.u32 %v2842_v54, %v2357_v55 }
  0x58   : > { %2769 = vmatmul.msk.bf16.gmra.mxu1 %vm897_vm1, %v2320_v59 }
  0x59   : > { %2798 = vmatmul.msk.bf16.gmra.mxu3 %vm897_vm1, %v2552_v62  ;;  %v2841_v62 = vld [vmem:[%s3031_s5 + $0x84] sm:$0xf0] }
  0x5a   : > { %v2348_v3 = vor.u32 %v2841_v62, %v2347_v61 }
  0x5b   : > { %1093 = vmatmul.bf16.gmra.mxu0 %v2308_v1  ;;  %v2897_v1 = vld [vmem:[%s3031_s5 + $0x244] sm:$0xf0] }
  0x5c   : > { %1233 = vmatmul.bf16.gmra.mxu2 %v2532_v2  ;;  %v3150_v2 = vld [vmem:[%s3985_s2] ss:$0 sm:$0xff]  ;;  %v2572_v5 = vor.u32 %v2897_v1, %v2571_v0  ;;  %v2901_v0 = vld [vmem:[%s3031_s5 + $0x264] sm:$0xf0] }
  0x68   : > { %2770 = vmatmul.msk.bf16.gmra.mxu1 %vm897_vm1, %v2328_v7  ;;  %v3156_v7 = vld [vmem:[%s3986_s3] ss:$0 sm:$0xff] }
  0x69   : > { %2799 = vmatmul.msk.bf16.gmra.mxu3 %vm897_vm1, %v2560_v10 }
  0x6b   : > { %1098 = vmatmul.bf16.gmra.mxu0 %v2316_v13 }
  0x6c   : > { %1238 = vmatmul.bf16.gmra.mxu2 %v2540_v14 }
  0x78   : > { %2771 = vmatmul.msk.bf16.gmra.mxu1 %vm897_vm1, %v2336_v19  ;;  %v2902_v19 = vld [vmem:[%s3031_s5 + $0x274] sm:$0xf] }
  0x79   : > { %2800 = vmatmul.msk.bf16.gmra.mxu3 %vm897_vm1, %v2568_v22  ;;  %v2368_v22 = vor.u32 %v2844_v15, %v2365_v16  ;;  %v2600_v27 = vor.u32 %v2902_v19, %v2597_v20 }
  0x7b   : > { %1103 = vmatmul.bf16.gmra.mxu0 %v2324_v25  ;;  %v2355_v25 = vld [vmem:[%s3031_s5 + $0x90] sm:$0xf] }
  0x7c   : > { %1243 = vmatmul.bf16.gmra.mxu2 %v2548_v26  ;;  %v2843_v26 = vld [vmem:[%s3031_s5 + $0x94] sm:$0xf0] }
  0x7d   : > { %v2356_v33 = vor.u32 %v2843_v26, %v2355_v25 }
  0x88   : > { %2772 = vmatmul.msk.bf16.gmra.mxu1 %vm897_vm1, %v2344_v31 }
  0x89   : > { %2801 = vmatmul.msk.bf16.gmra.mxu3 %vm897_vm1, %v2576_v34 }
  0x8b   : > { %1108 = vmatmul.bf16.gmra.mxu0 %v2332_v37 }
  0x8c   : > { %1248 = vmatmul.bf16.gmra.mxu2 %v2556_v38 }
  0x95   : > { %v1368_v44 = vpop.f32.mrf.mxu1 }
  0x98   : > { %2773 = vmatmul.msk.bf16.gmra.mxu1 %vm897_vm1, %v2352_v43 }
  0x99   : > { %2802 = vmatmul.msk.bf16.gmra.mxu3 %vm897_vm1, %v2584_v47  ;;  %v2373_v47 = vld [vmem:[%s3031_s5 + $0xb8] sm:$0xf0] }
  0x9a   : > { %v2376_v55 = vor.u32 %v2846_v46, %v2373_v47 }
  0x9b   : > { %1113 = vmatmul.bf16.gmra.mxu0 %v2340_v50  ;;  %v2904_v50 = vld [vmem:[%s3031_s5 + $0x284] sm:$0xf] }
  0x9c   : > { %v3134_v52 = vpop.f32.mrf.mxu3  ;;  %1253 = vmatmul.bf16.gmra.mxu2 %v2564_v51  ;;  %v2605_v51 = vld [vmem:[%s3031_s5 + $0x288] sm:$0xf0] }
  0x9d   : > { %v1370_v53 = vpop.f32.mrf.mxu1  ;;  %v2608_v61 = vor.u32 %v2904_v50, %v2605_v51 }
  0xa4   : > { %v3140_v59 = vpop.f32.mrf.mxu3 }
  0xa5   : > { %v1373_v60 = vpop.f32.mrf.mxu1 }
  0xa8   : > { %2774 = vmatmul.msk.bf16.gmra.mxu1 %vm897_vm1, %v2360_v58  ;;  %v1079_v4 = vpop.f32.mrf.mxu0  ;;  %v2363_v58 = vld [vmem:[%s3031_s5 + $0xa0] sm:$0xf] }
  0xa9   : > { %2803 = vmatmul.msk.bf16.gmra.mxu3 %vm897_vm1, %v2592_v63  ;;  %v1369_v6 = vadd.f32 %v1368_v44, %v1079_v4  ;;  %v2587_v63 = vld [vmem:[%s3031_s5 + $0x260] sm:$0xf] }
  0xab   : > { %v1652_v8 = vmul.f32 %v3150_v2, %v1369_v6  ;;  %1118 = vmatmul.bf16.gmra.mxu0 %v2348_v3 }
  0xac   : > { %v3159_v9 = vpop.f32.mrf.mxu3  ;;  %1258 = vmatmul.bf16.gmra.mxu2 %v2572_v5 }
  0xad   : > { %v1375_v10 = vpop.f32.mrf.mxu1  ;;  %v1768_v11 = vadd.f32 %v3156_v7, %v1652_v8 }
  0xaf   : > { %v1880_v12 = vmax.f32 %v1768_v11, 0.0  ;;  %v3163_v13 = vpop.f32.mrf.mxu2  ;;  %v2588_v11 = vor.u32 %v2901_v0, %v2587_v63 }
  0xb0   : > { %v1081_v14 = vpop.f32.mrf.mxu0 }
  0xb1   : > { %v1992_v17 = vpack.c.bf16 %v1880_v12, %v1880_v12  ;;  %v1371_v18 = vadd.f32 %v1370_v53, %v1081_v14 }
  0xb3   : > { %2105 = vst.msk [vmem:[%s3168_s25] sm:$0xf] %vm2104_vm2, %v1992_v17  ;;  %v1653_v21 = vmul.f32 %v3150_v2, %v1371_v18 }
  0xb4   : > { %v3177_v23 = vpop.f32.mrf.mxu3 }
  0xb5   : > { %v1378_v24 = vpop.f32.mrf.mxu1  ;;  %v1769_v28 = vadd.f32 %v3156_v7, %v1653_v21 }
  0xb7   : > { %v1881_v31 = vmax.f32 %v1769_v28, 0.0  ;;  %v3184_v32 = vpop.f32.mrf.mxu2  ;;  %v2381_v28 = vld [vmem:[%s3031_s5 + $0xc8] sm:$0xf0] }
  0xb8   : > { %2775 = vmatmul.msk.bf16.gmra.mxu1 %vm897_vm1, %v2368_v22  ;;  %v1084_v34 = vpop.f32.mrf.mxu0 }
  0xb9   : > { %2804 = vmatmul.msk.bf16.gmra.mxu3 %vm897_vm1, %v2600_v27  ;;  %v1993_v36 = vpack.c.bf16 %v1881_v31, %v1881_v31  ;;  %v1374_v37 = vadd.f32 %v1373_v60, %v1084_v34  ;;  %v2845_v60 = vld [vmem:[%s3031_s5 + $0xa4] sm:$0xf0]  ;;  %v2848_v27 = vld [vmem:[%s3031_s5 + $0xc4] sm:$0xf]  ;;  %v2906_v31 = vld [vmem:[%s3031_s5 + $0x294] sm:$0xf] }
  0xba   : > { %v2364_v5 = vor.u32 %v2845_v60, %v2363_v58 }
  0xbb   : > { %2106 = vst.msk [vmem:[%s3168_s25 + $0x4] sm:$0xf] %vm2104_vm2, %v1993_v36  ;;  %v1654_v38 = vmul.f32 %v3150_v2, %v1374_v37  ;;  %1123 = vmatmul.bf16.gmra.mxu0 %v2356_v33  ;;  %v2613_v33 = vld [vmem:[%s3031_s5 + $0x298] sm:$0xf0] }
  0xbc   : > { %v3191_v39 = vpop.f32.mrf.mxu3  ;;  %1263 = vmatmul.bf16.gmra.mxu2 %v2580_v35 }
  0xbd   : > { %v1380_v40 = vpop.f32.mrf.mxu1  ;;  %v1770_v41 = vadd.f32 %v3156_v7, %v1654_v38 }
  0xbf   : > { %v1882_v42 = vmax.f32 %v1770_v41, 0.0  ;;  %v1224_v43 = vpop.f32.mrf.mxu2  ;;  %v2371_v41 = vld [vmem:[%s3031_s5 + $0xb0] sm:$0xf] }
  0xc0   : > { %v1514_v44 = vadd.f32 %v3134_v52, %v1224_v43  ;;  %v1086_v45 = vpop.f32.mrf.mxu0 }
  0xc1   : > { %v1994_v48 = vpack.c.bf16 %v1882_v42, %v1882_v42  ;;  %v1376_v49 = vadd.f32 %v1375_v10, %v1086_v45  ;;  %v2616_v42 = vor.u32 %v2906_v31, %v2613_v33  ;;  %v2903_v45 = vld [vmem:[%s3031_s5 + $0x274] sm:$0xf0] }
  0xc2   : > { %v1710_v53 = vmul.f32 %v3150_v2, %v1514_v44  ;;  %v2595_v44 = vld [vmem:[%s3031_s5 + $0x270] sm:$0xf] }
  0xc3   : > { %2107 = vst.msk [vmem:[%s3168_s25 + $0x8] sm:$0xf] %vm2104_vm2, %v1994_v48  ;;  %v1655_v54 = vmul.f32 %v3150_v2, %v1376_v49 }
  0xc4   : > { %v3203_v56 = vpop.f32.mrf.mxu3  ;;  %v1826_v52 = vadd.f32 %v3156_v7, %v1710_v53 }
  0xc5   : > { %v3206_v57 = vpop.f32.mrf.mxu1  ;;  %v1771_v62 = vadd.f32 %v3156_v7, %v1655_v54  ;;  %v2596_v54 = vor.u32 %v2903_v45, %v2595_v44 }
  0xc6   : > { %v1938_v1 = vmax.f32 %v1826_v52, 0.0 }
  0xc7   : > { %v1883_v3 = vmax.f32 %v1771_v62, 0.0  ;;  %v1226_v4 = vpop.f32.mrf.mxu2 }
  0xc8   : > { %2776 = vmatmul.msk.bf16.gmra.mxu1 %vm897_vm1, %v2376_v55  ;;  %v2050_v6 = vpack.c.bf16 %v1938_v1, %v1938_v1  ;;  %v1516_v8 = vadd.f32 %v3140_v59, %v1226_v4  ;;  %v1089_v10 = vpop.f32.mrf.mxu0 }
  0xc9   : > { %2805 = vmatmul.msk.bf16.gmra.mxu3 %vm897_vm1, %v2608_v61  ;;  %v1995_v12 = vpack.c.bf16 %v1883_v3, %v1883_v3  ;;  %v1379_v14 = vadd.f32 %v1378_v24, %v1089_v10 }
  0xca   : > { %2163 = vst.msk [vmem:[%s3168_s25 + $0xe8] sm:$0xf] %vm2104_vm2, %v2050_v6  ;;  %v1711_v15 = vmul.f32 %v3150_v2, %v1516_v8  ;;  %v2850_v6 = vld [vmem:[%s3031_s5 + $0xd4] sm:$0xf]  ;;  %v2389_v8 = vld [vmem:[%s3031_s5 + $0xd8] sm:$0xf0] }
  0xcb   : > { %2108 = vst.msk [vmem:[%s3168_s25 + $0xc] sm:$0xf] %vm2104_vm2, %v1995_v12  ;;  %v1656_v16 = vmul.f32 %v3150_v2, %v1379_v14  ;;  %1128 = vmatmul.bf16.gmra.mxu0 %v2364_v5  ;;  %v2908_v12 = vld [vmem:[%s3031_s5 + $0x2a4] sm:$0xf]  ;;  %v2621_v14 = vld [vmem:[%s3031_s5 + $0x2a8] sm:$0xf0] }
  0xcc   : > { %v3222_v17 = vpop.f32.mrf.mxu3  ;;  %v1827_v59 = vadd.f32 %v3156_v7, %v1711_v15  ;;  %1268 = vmatmul.bf16.gmra.mxu2 %v2588_v11 }
  0xcd   : > { %v1385_v18 = vpop.f32.mrf.mxu1  ;;  %v1772_v19 = vadd.f32 %v3156_v7, %v1656_v16 }
  0xce   : > { %v1939_v20 = vmax.f32 %v1827_v59, 0.0 }
  0xcf   : > { %v1884_v21 = vmax.f32 %v1772_v19, 0.0  ;;  %v1229_v22 = vpop.f32.mrf.mxu2 }
  0xd0   : > { %v2051_v24 = vpack.c.bf16 %v1939_v20, %v1939_v20  ;;  %v1519_v25 = vadd.f32 %v3159_v9, %v1229_v22  ;;  %v1091_v26 = vpop.f32.mrf.mxu0  ;;  %v2384_v9 = vor.u32 %v2848_v27, %v2381_v28  ;;  %v2624_v22 = vor.u32 %v2908_v12, %v2621_v14 }
  0xd1   : > { %v1996_v29 = vpack.c.bf16 %v1884_v21, %v1884_v21  ;;  %v1381_v30 = vadd.f32 %v1380_v40, %v1091_v26  ;;  %v2847_v40 = vld [vmem:[%s3031_s5 + $0xb4] sm:$0xf0]  ;;  %v2379_v21 = vld [vmem:[%s3031_s5 + $0xc0] sm:$0xf]  ;;  %v2905_v26 = vld [vmem:[%s3031_s5 + $0x284] sm:$0xf0] }
  0xd2   : > { %2164 = vst.msk [vmem:[%s3168_s25 + $0xec] sm:$0xf] %vm2104_vm2, %v2051_v24  ;;  %v1712_v34 = vmul.f32 %v3150_v2, %v1519_v25  ;;  %v2372_v49 = vor.u32 %v2847_v40, %v2371_v41  ;;  %v2603_v25 = vld [vmem:[%s3031_s5 + $0x280] sm:$0xf] }
  0xd3   : > { %2109 = vst.msk [vmem:[%s3168_s25 + $0x10] sm:$0xf] %vm2104_vm2, %v1996_v29  ;;  %v1657_v35 = vmul.f32 %v3150_v2, %v1381_v30 }
  0xd4   : > { %v3237_v36 = vpop.f32.mrf.mxu3  ;;  %v1828_v37 = vadd.f32 %v3156_v7, %v1712_v34 }
  0xd5   : > { %v3240_v38 = vpop.f32.mrf.mxu1  ;;  %v1773_v43 = vadd.f32 %v3156_v7, %v1657_v35  ;;  %v2604_v35 = vor.u32 %v2905_v26, %v2603_v25 }
  0xd6   : > { %v1940_v46 = vmax.f32 %v1828_v37, 0.0 }
  0xd7   : > { %v1885_v47 = vmax.f32 %v1773_v43, 0.0  ;;  %v1231_v48 = vpop.f32.mrf.mxu2 }
  0xd8   : > { %2777 = vmatmul.msk.bf16.gmra.mxu1 %vm897_vm1, %v2384_v9  ;;  %v2052_v50 = vpack.c.bf16 %v1940_v46, %v1940_v46  ;;  %v1521_v51 = vadd.f32 %v3177_v23, %v1231_v48  ;;  %v1094_v53 = vpop.f32.mrf.mxu0 }
  0xd9   : > { %2806 = vmatmul.msk.bf16.gmra.mxu3 %vm897_vm1, %v2616_v42  ;;  %v1997_v55 = vpack.c.bf16 %v1885_v47, %v1885_v47  ;;  %v1384_v52 = vadd.f32 %v3206_v57, %v1094_v53 }
  0xda   : > { %2165 = vst.msk [vmem:[%s3168_s25 + $0xf0] sm:$0xf] %vm2104_vm2, %v2052_v50  ;;  %v1713_v58 = vmul.f32 %v3150_v2, %v1521_v51  ;;  %v2852_v50 = vld [vmem:[%s3031_s5 + $0xe4] sm:$0xf]  ;;  %v2397_v51 = vld [vmem:[%s3031_s5 + $0xe8] sm:$0xf0] }
  0xdb   : > { %2110 = vst.msk [vmem:[%s3168_s25 + $0x14] sm:$0xf] %vm2104_vm2, %v1997_v55  ;;  %v1658_v60 = vmul.f32 %v3150_v2, %v1384_v52  ;;  %1133 = vmatmul.bf16.gmra.mxu0 %v2372_v49  ;;  %v2910_v55 = vld [vmem:[%s3031_s5 + $0x2b4] sm:$0xf]  ;;  %v2629_v52 = vld [vmem:[%s3031_s5 + $0x2b8] sm:$0xf0] }
  0xdc   : > { %v3257_v23 = vpop.f32.mrf.mxu3  ;;  %v1829_v61 = vadd.f32 %v3156_v7, %v1713_v58  ;;  %1273 = vmatmul.bf16.gmra.mxu2 %v2596_v54 }
  0xdd   : > { %v1390_v57 = vpop.f32.mrf.mxu1  ;;  %v1774_v62 = vadd.f32 %v3156_v7, %v1658_v60 }
  0xde   : > { %v1941_v63 = vmax.f32 %v1829_v61, 0.0 }
  0xdf   : > { %v1886_v0 = vmax.f32 %v1774_v62, 0.0  ;;  %v1234_v1 = vpop.f32.mrf.mxu2 }
  0xe0   : > { %v2053_v3 = vpack.c.bf16 %v1941_v63, %v1941_v63  ;;  %v1524_v4 = vadd.f32 %v3191_v39, %v1234_v1  ;;  %v1096_v5 = vpop.f32.mrf.mxu0  ;;  %v2392_v39 = vor.u32 %v2850_v6, %v2389_v8  ;;  %v2632_v1 = vor.u32 %v2910_v55, %v2629_v52 }
  0xe1   : > { %v1998_v10 = vpack.c.bf16 %v1886_v0, %v1886_v0  ;;  %v1386_v11 = vadd.f32 %v1385_v18, %v1096_v5  ;;  %v2849_v18 = vld [vmem:[%s3031_s5 + $0xc4] sm:$0xf0]  ;;  %v2387_v0 = vld [vmem:[%s3031_s5 + $0xd0] sm:$0xf]  ;;  %v2907_v5 = vld [vmem:[%s3031_s5 + $0x294] sm:$0xf0] }
  0xe2   : > { %2166 = vst.msk [vmem:[%s3168_s25 + $0xf4] sm:$0xf] %vm2104_vm2, %v2053_v3  ;;  %v1714_v15 = vmul.f32 %v3150_v2, %v1524_v4  ;;  %v2380_v30 = vor.u32 %v2849_v18, %v2379_v21  ;;  %v2611_v4 = vld [vmem:[%s3031_s5 + $0x290] sm:$0xf] }
  0xe3   : > { %2111 = vst.msk [vmem:[%s3168_s25 + $0x18] sm:$0xf] %vm2104_vm2, %v1998_v10  ;;  %v1659_v16 = vmul.f32 %v3150_v2, %v1386_v11 }
  0xe4   : > { %v3272_v59 = vpop.f32.mrf.mxu3  ;;  %v1830_v19 = vadd.f32 %v3156_v7, %v1714_v15 }
  0xe5   : > { %v3275_v20 = vpop.f32.mrf.mxu1  ;;  %v1775_v24 = vadd.f32 %v3156_v7, %v1659_v16  ;;  %v2612_v16 = vor.u32 %v2907_v5, %v2611_v4 }
  0xe6   : > { %v1942_v27 = vmax.f32 %v1830_v19, 0.0 }
  0xe7   : > { %v1887_v28 = vmax.f32 %v1775_v24, 0.0  ;;  %v1236_v29 = vpop.f32.mrf.mxu2 }
  0xe8   : > { %2778 = vmatmul.msk.bf16.gmra.mxu1 %vm897_vm1, %v2392_v39  ;;  %v2054_v31 = vpack.c.bf16 %v1942_v27, %v1942_v27  ;;  %v1526_v33 = vadd.f32 %v3203_v56, %v1236_v29  ;;  %v1099_v34 = vpop.f32.mrf.mxu0 }
  0xe9   : > { %2807 = vmatmul.msk.bf16.gmra.mxu3 %vm897_vm1, %v2624_v22  ;;  %v1999_v9 = vpack.c.bf16 %v1887_v28, %v1887_v28  ;;  %v1389_v37 = vadd.f32 %v3240_v38, %v1099_v34 }
  0xea   : > { %2167 = vst.msk [vmem:[%s3168_s25 + $0xf8] sm:$0xf] %vm2104_vm2, %v2054_v31  ;;  %v1715_v41 = vmul.f32 %v3150_v2, %v1526_v33  ;;  %v2854_v31 = vld [vmem:[%s3031_s5 + $0xf4] sm:$0xf]  ;;  %v2405_v33 = vld [vmem:[%s3031_s5 + $0xf8] sm:$0xf0] }
  0xeb   : > { %2112 = vst.msk [vmem:[%s3168_s25 + $0x1c] sm:$0xf] %vm2104_vm2, %v1999_v9  ;;  %v1660_v40 = vmul.f32 %v3150_v2, %v1389_v37  ;;  %1138 = vmatmul.bf16.gmra.mxu0 %v2380_v30  ;;  %v2912_v9 = vld [vmem:[%s3031_s5 + $0x2c4] sm:$0xf]  ;;  %v2637_v37 = vld [vmem:[%s3031_s5 + $0x2c8] sm:$0xf0] }
  0xec   : > { %v3292_v56 = vpop.f32.mrf.mxu3  ;;  %v1831_v42 = vadd.f32 %v3156_v7, %v1715_v41  ;;  %1278 = vmatmul.bf16.gmra.mxu2 %v2604_v35 }
  0xed   : > { %v1395_v38 = vpop.f32.mrf.mxu1  ;;  %v1776_v43 = vadd.f32 %v3156_v7, %v1660_v40 }
  0xee   : > { %v1943_v44 = vmax.f32 %v1831_v42, 0.0 }
  0xef   : > { %v1888_v45 = vmax.f32 %v1776_v43, 0.0  ;;  %v1239_v46 = vpop.f32.mrf.mxu2 }
  0xf0   : > { %v2055_v47 = vpack.c.bf16 %v1943_v44, %v1943_v44  ;;  %v1529_v48 = vadd.f32 %v3222_v17, %v1239_v46  ;;  %v1101_v49 = vpop.f32.mrf.mxu0  ;;  %v2400_v17 = vor.u32 %v2852_v50, %v2397_v51  ;;  %v2640_v46 = vor.u32 %v2912_v9, %v2637_v37 }
  0xf1   : > { %v2000_v53 = vpack.c.bf16 %v1888_v45, %v1888_v45  ;;  %v1391_v54 = vadd.f32 %v1390_v57, %v1101_v49  ;;  %v2851_v57 = vld [vmem:[%s3031_s5 + $0xd4] sm:$0xf0]  ;;  %v2395_v45 = vld [vmem:[%s3031_s5 + $0xe0] sm:$0xf]  ;;  %v2909_v49 = vld [vmem:[%s3031_s5 + $0x2a4] sm:$0xf0] }
  0xf2   : > { %2168 = vst.msk [vmem:[%s3168_s25 + $0xfc] sm:$0xf] %vm2104_vm2, %v2055_v47  ;;  %v1716_v58 = vmul.f32 %v3150_v2, %v1529_v48  ;;  %v2388_v11 = vor.u32 %v2851_v57, %v2387_v0  ;;  %v2619_v48 = vld [vmem:[%s3031_s5 + $0x2a0] sm:$0xf] }
  0xf3   : > { %2113 = vst.msk [vmem:[%s3168_s25 + $0x20] sm:$0xf] %vm2104_vm2, %v2000_v53  ;;  %v1661_v60 = vmul.f32 %v3150_v2, %v1391_v54 }
  0xf4   : > { %v3307_v61 = vpop.f32.mrf.mxu3  ;;  %v1832_v62 = vadd.f32 %v3156_v7, %v1716_v58 }
  0xf5   : > { %v3310_v63 = vpop.f32.mrf.mxu1  ;;  %v1777_v3 = vadd.f32 %v3156_v7, %v1661_v60  ;;  %v2620_v60 = vor.u32 %v2909_v49, %v2619_v48 }
  0xf6   : > { %v1944_v6 = vmax.f32 %v1832_v62, 0.0 }
  0xf7   : > { %v1889_v8 = vmax.f32 %v1777_v3, 0.0  ;;  %v1241_v10 = vpop.f32.mrf.mxu2 }
  0xf8   : > { %2779 = vmatmul.msk.bf16.gmra.mxu1 %vm897_vm1, %v2400_v17  ;;  %v2056_v12 = vpack.c.bf16 %v1944_v6, %v1944_v6  ;;  %v1531_v14 = vadd.f32 %v3237_v36, %v1241_v10  ;;  %v1104_v15 = vpop.f32.mrf.mxu0 }
  0xf9   : > { %2808 = vmatmul.msk.bf16.gmra.mxu3 %vm897_vm1, %v2632_v1  ;;  %v2001_v39 = vpack.c.bf16 %v1889_v8, %v1889_v8  ;;  %v1394_v19 = vadd.f32 %v3275_v20, %v1104_v15 }
  0xfa   : > { %2169 = vst.msk [vmem:[%s3168_s25 + $0x100] sm:$0xf] %vm2104_vm2, %v2056_v12  ;;  %v1717_v21 = vmul.f32 %v3150_v2, %v1531_v14  ;;  %v2856_v12 = vld [vmem:[%s3031_s5 + $0x104] sm:$0xf]  ;;  %v2413_v14 = vld [vmem:[%s3031_s5 + $0x108] sm:$0xf0] }
  0xfb   : > { %2114 = vst.msk [vmem:[%s3168_s25 + $0x24] sm:$0xf] %vm2104_vm2, %v2001_v39  ;;  %v1662_v18 = vmul.f32 %v3150_v2, %v1394_v19  ;;  %1143 = vmatmul.bf16.gmra.mxu0 %v2388_v11  ;;  %v2914_v39 = vld [vmem:[%s3031_s5 + $0x2d4] sm:$0xf]  ;;  %v2645_v19 = vld [vmem:[%s3031_s5 + $0x2d8] sm:$0xf0] }
  0xfc   : > { %v3327_v36 = vpop.f32.mrf.mxu3  ;;  %v1833_v22 = vadd.f32 %v3156_v7, %v1717_v21  ;;  %1283 = vmatmul.bf16.gmra.mxu2 %v2612_v16 }
  0xfd   : > { %v1400_v20 = vpop.f32.mrf.mxu1  ;;  %v1778_v24 = vadd.f32 %v3156_v7, %v1662_v18 }
  0xfe   : > { %v1945_v25 = vmax.f32 %v1833_v22, 0.0 }
  0xff   : > { %v1890_v26 = vmax.f32 %v1778_v24, 0.0  ;;  %v1244_v27 = vpop.f32.mrf.mxu2 }
 0x100   : > { %v2057_v28 = vpack.c.bf16 %v1945_v25, %v1945_v25  ;;  %v1534_v29 = vadd.f32 %v3257_v23, %v1244_v27  ;;  %v1106_v30 = vpop.f32.mrf.mxu0  ;;  %v2408_v23 = vor.u32 %v2854_v31, %v2405_v33  ;;  %v2648_v27 = vor.u32 %v2914_v39, %v2645_v19 }
 0x101   : > { %v2002_v34 = vpack.c.bf16 %v1890_v26, %v1890_v26  ;;  %v1396_v35 = vadd.f32 %v1395_v38, %v1106_v30  ;;  %v2853_v38 = vld [vmem:[%s3031_s5 + $0xe4] sm:$0xf0]  ;;  %v2403_v26 = vld [vmem:[%s3031_s5 + $0xf0] sm:$0xf]  ;;  %v2911_v30 = vld [vmem:[%s3031_s5 + $0x2b4] sm:$0xf0] }
 0x102   : > { %2170 = vst.msk [vmem:[%s3168_s25 + $0x104] sm:$0xf] %vm2104_vm2, %v2057_v28  ;;  %v1718_v41 = vmul.f32 %v3150_v2, %v1534_v29  ;;  %v2396_v54 = vor.u32 %v2853_v38, %v2395_v45  ;;  %v2627_v29 = vld [vmem:[%s3031_s5 + $0x2b0] sm:$0xf] }
 0x103   : > { %2115 = vst.msk [vmem:[%s3168_s25 + $0x28] sm:$0xf] %vm2104_vm2, %v2002_v34  ;;  %v1663_v40 = vmul.f32 %v3150_v2, %v1396_v35 }
 0x104   : > { %v3342_v42 = vpop.f32.mrf.mxu3  ;;  %v1834_v43 = vadd.f32 %v3156_v7, %v1718_v41 }
 0x105   : > { %v3345_v44 = vpop.f32.mrf.mxu1  ;;  %v1779_v47 = vadd.f32 %v3156_v7, %v1663_v40  ;;  %v2628_v40 = vor.u32 %v2911_v30, %v2627_v29 }
 0x106   : > { %v1946_v50 = vmax.f32 %v1834_v43, 0.0 }
 0x107   : > { %v1891_v51 = vmax.f32 %v1779_v47, 0.0  ;;  %v1246_v53 = vpop.f32.mrf.mxu2 }
 0x108   : > { %2780 = vmatmul.msk.bf16.gmra.mxu1 %vm897_vm1, %v2408_v23  ;;  %v2058_v55 = vpack.c.bf16 %v1946_v50, %v1946_v50  ;;  %v1536_v52 = vadd.f32 %v3272_v59, %v1246_v53  ;;  %v1109_v58 = vpop.f32.mrf.mxu0 }
 0x109   : > { %2809 = vmatmul.msk.bf16.gmra.mxu3 %vm897_vm1, %v2640_v46  ;;  %v2003_v17 = vpack.c.bf16 %v1891_v51, %v1891_v51  ;;  %v1399_v62 = vadd.f32 %v3310_v63, %v1109_v58 }
 0x10a   : > { %2171 = vst.msk [vmem:[%s3168_s25 + $0x108] sm:$0xf] %vm2104_vm2, %v2058_v55  ;;  %v1719_v0 = vmul.f32 %v3150_v2, %v1536_v52  ;;  %v2858_v55 = vld [vmem:[%s3031_s5 + $0x114] sm:$0xf]  ;;  %v2421_v52 = vld [vmem:[%s3031_s5 + $0x118] sm:$0xf0] }
 0x10b   : > { %2116 = vst.msk [vmem:[%s3168_s25 + $0x2c] sm:$0xf] %vm2104_vm2, %v2003_v17  ;;  %v1664_v57 = vmul.f32 %v3150_v2, %v1399_v62  ;;  %1148 = vmatmul.bf16.gmra.mxu0 %v2396_v54  ;;  %v2916_v17 = vld [vmem:[%s3031_s5 + $0x2e4] sm:$0xf]  ;;  %v2653_v62 = vld [vmem:[%s3031_s5 + $0x2e8] sm:$0xf0] }
 0x10c   : > { %v3362_v59 = vpop.f32.mrf.mxu3  ;;  %v1835_v1 = vadd.f32 %v3156_v7, %v1719_v0  ;;  %1288 = vmatmul.bf16.gmra.mxu2 %v2620_v60 }
 0x10d   : > { %v1405_v63 = vpop.f32.mrf.mxu1  ;;  %v1780_v3 = vadd.f32 %v3156_v7, %v1664_v57 }
 0x10e   : > { %v1947_v4 = vmax.f32 %v1835_v1, 0.0 }
 0x10f   : > { %v1892_v5 = vmax.f32 %v1780_v3, 0.0  ;;  %v1249_v6 = vpop.f32.mrf.mxu2 }
 0x110   : > { %v2059_v8 = vpack.c.bf16 %v1947_v4, %v1947_v4  ;;  %v1539_v10 = vadd.f32 %v3292_v56, %v1249_v6  ;;  %v1111_v11 = vpop.f32.mrf.mxu0  ;;  %v2416_v56 = vor.u32 %v2856_v12, %v2413_v14  ;;  %v2656_v6 = vor.u32 %v2916_v17, %v2653_v62 }
 0x111   : > { %v2004_v15 = vpack.c.bf16 %v1892_v5, %v1892_v5  ;;  %v1401_v16 = vadd.f32 %v1400_v20, %v1111_v11  ;;  %v2855_v20 = vld [vmem:[%s3031_s5 + $0xf4] sm:$0xf0]  ;;  %v2411_v5 = vld [vmem:[%s3031_s5 + $0x100] sm:$0xf]  ;;  %v2913_v11 = vld [vmem:[%s3031_s5 + $0x2c4] sm:$0xf0] }
 0x112   : > { %2172 = vst.msk [vmem:[%s3168_s25 + $0x10c] sm:$0xf] %vm2104_vm2, %v2059_v8  ;;  %v1720_v21 = vmul.f32 %v3150_v2, %v1539_v10  ;;  %v2404_v35 = vor.u32 %v2855_v20, %v2403_v26  ;;  %v2635_v10 = vld [vmem:[%s3031_s5 + $0x2c0] sm:$0xf] }
 0x113   : > { %2117 = vst.msk [vmem:[%s3168_s25 + $0x30] sm:$0xf] %vm2104_vm2, %v2004_v15  ;;  %v1665_v18 = vmul.f32 %v3150_v2, %v1401_v16 }
 0x114   : > { %v3377_v22 = vpop.f32.mrf.mxu3  ;;  %v1836_v24 = vadd.f32 %v3156_v7, %v1720_v21 }
 0x115   : > { %v3380_v25 = vpop.f32.mrf.mxu1  ;;  %v1781_v28 = vadd.f32 %v3156_v7, %v1665_v18  ;;  %v2636_v18 = vor.u32 %v2913_v11, %v2635_v10 }
 0x116   : > { %v1948_v31 = vmax.f32 %v1836_v24, 0.0 }
 0x117   : > { %v1893_v33 = vmax.f32 %v1781_v28, 0.0  ;;  %v1251_v34 = vpop.f32.mrf.mxu2 }
 0x118   : > { %2781 = vmatmul.msk.bf16.gmra.mxu1 %vm897_vm1, %v2416_v56  ;;  %v2060_v9 = vpack.c.bf16 %v1948_v31, %v1948_v31  ;;  %v1541_v37 = vadd.f32 %v3307_v61, %v1251_v34  ;;  %v1114_v41 = vpop.f32.mrf.mxu0 }
 0x119   : > { %2810 = vmatmul.msk.bf16.gmra.mxu3 %vm897_vm1, %v2648_v27  ;;  %v2005_v23 = vpack.c.bf16 %v1893_v33, %v1893_v33  ;;  %v1404_v43 = vadd.f32 %v3345_v44, %v1114_v41 }
 0x11a   : > { %2173 = vst.msk [vmem:[%s3168_s25 + $0x110] sm:$0xf] %vm2104_vm2, %v2060_v9  ;;  %v1721_v45 = vmul.f32 %v3150_v2, %v1541_v37  ;;  %v2860_v9 = vld [vmem:[%s3031_s5 + $0x124] sm:$0xf]  ;;  %v2429_v37 = vld [vmem:[%s3031_s5 + $0x128] sm:$0xf0] }
 0x11b   : > { %2118 = vst.msk [vmem:[%s3168_s25 + $0x34] sm:$0xf] %vm2104_vm2, %v2005_v23  ;;  %v1666_v38 = vmul.f32 %v3150_v2, %v1404_v43  ;;  %1153 = vmatmul.bf16.gmra.mxu0 %v2404_v35  ;;  %v2918_v23 = vld [vmem:[%s3031_s5 + $0x2f4] sm:$0xf]  ;;  %v2661_v43 = vld [vmem:[%s3031_s5 + $0x2f8] sm:$0xf0] }
 0x11c   : > { %v3397_v61 = vpop.f32.mrf.mxu3  ;;  %v1837_v46 = vadd.f32 %v3156_v7, %v1721_v45  ;;  %1293 = vmatmul.bf16.gmra.mxu2 %v2628_v40 }
 0x11d   : > { %v1410_v44 = vpop.f32.mrf.mxu1  ;;  %v1782_v47 = vadd.f32 %v3156_v7, %v1666_v38 }
 0x11e   : > { %v1949_v48 = vmax.f32 %v1837_v46, 0.0 }
 0x11f   : > { %v1894_v49 = vmax.f32 %v1782_v47, 0.0  ;;  %v1254_v50 = vpop.f32.mrf.mxu2 }
 0x120   : > { %v2061_v51 = vpack.c.bf16 %v1949_v48, %v1949_v48  ;;  %v1544_v53 = vadd.f32 %v3327_v36, %v1254_v50  ;;  %v1116_v54 = vpop.f32.mrf.mxu0  ;;  %v2424_v36 = vor.u32 %v2858_v55, %v2421_v52  ;;  %v2664_v50 = vor.u32 %v2918_v23, %v2661_v43 }
 0x121   : > { %v2006_v58 = vpack.c.bf16 %v1894_v49, %v1894_v49  ;;  %v1406_v60 = vadd.f32 %v1405_v63, %v1116_v54  ;;  %v2857_v63 = vld [vmem:[%s3031_s5 + $0x104] sm:$0xf0]  ;;  %v2419_v49 = vld [vmem:[%s3031_s5 + $0x110] sm:$0xf]  ;;  %v2915_v54 = vld [vmem:[%s3031_s5 + $0x2d4] sm:$0xf0] }
 0x122   : > { %2174 = vst.msk [vmem:[%s3168_s25 + $0x114] sm:$0xf] %vm2104_vm2, %v2061_v51  ;;  %v1722_v0 = vmul.f32 %v3150_v2, %v1544_v53  ;;  %v2412_v16 = vor.u32 %v2857_v63, %v2411_v5  ;;  %v2643_v53 = vld [vmem:[%s3031_s5 + $0x2d0] sm:$0xf] }
 0x123   : > { %2119 = vst.msk [vmem:[%s3168_s25 + $0x38] sm:$0xf] %vm2104_vm2, %v2006_v58  ;;  %v1667_v57 = vmul.f32 %v3150_v2, %v1406_v60 }
 0x124   : > { %v3412_v1 = vpop.f32.mrf.mxu3  ;;  %v1838_v3 = vadd.f32 %v3156_v7, %v1722_v0 }
 0x125   : > { %v3415_v4 = vpop.f32.mrf.mxu1  ;;  %v1783_v8 = vadd.f32 %v3156_v7, %v1667_v57  ;;  %v2644_v57 = vor.u32 %v2915_v54, %v2643_v53 }
 0x126   : > { %v1950_v12 = vmax.f32 %v1838_v3, 0.0 }
 0x127   : > { %v1895_v14 = vmax.f32 %v1783_v8, 0.0  ;;  %v1256_v15 = vpop.f32.mrf.mxu2 }
 0x128   : > { %2782 = vmatmul.msk.bf16.gmra.mxu1 %vm897_vm1, %v2424_v36  ;;  %v2062_v39 = vpack.c.bf16 %v1950_v12, %v1950_v12  ;;  %v1546_v19 = vadd.f32 %v3342_v42, %v1256_v15  ;;  %v1119_v21 = vpop.f32.mrf.mxu0 }
 0x129   : > { %2811 = vmatmul.msk.bf16.gmra.mxu3 %vm897_vm1, %v2656_v6  ;;  %v2007_v56 = vpack.c.bf16 %v1895_v14, %v1895_v14  ;;  %v1409_v24 = vadd.f32 %v3380_v25, %v1119_v21 }
 0x12a   : > { %2175 = vst.msk [vmem:[%s3168_s25 + $0x118] sm:$0xf] %vm2104_vm2, %v2062_v39  ;;  %v1723_v26 = vmul.f32 %v3150_v2, %v1546_v19  ;;  %v2862_v39 = vld [vmem:[%s3031_s5 + $0x134] sm:$0xf]  ;;  %v2437_v19 = vld [vmem:[%s3031_s5 + $0x138] sm:$0xf0] }
 0x12b   : > { %2120 = vst.msk [vmem:[%s3168_s25 + $0x3c] sm:$0xf] %vm2104_vm2, %v2007_v56  ;;  %v1668_v20 = vmul.f32 %v3150_v2, %v1409_v24  ;;  %1158 = vmatmul.bf16.gmra.mxu0 %v2412_v16  ;;  %v2920_v56 = vld [vmem:[%s3031_s5 + $0x304] sm:$0xf]  ;;  %v2669_v24 = vld [vmem:[%s3031_s5 + $0x308] sm:$0xf0] }
 0x12c   : > { %v3432_v42 = vpop.f32.mrf.mxu3  ;;  %v1839_v27 = vadd.f32 %v3156_v7, %v1723_v26  ;;  %1298 = vmatmul.bf16.gmra.mxu2 %v2636_v18 }
 0x12d   : > { %v1415_v25 = vpop.f32.mrf.mxu1  ;;  %v1784_v28 = vadd.f32 %v3156_v7, %v1668_v20 }
 0x12e   : > { %v1951_v29 = vmax.f32 %v1839_v27, 0.0 }
 0x12f   : > { %v1896_v30 = vmax.f32 %v1784_v28, 0.0  ;;  %v1259_v31 = vpop.f32.mrf.mxu2 }
 0x130   : > { %v2063_v33 = vpack.c.bf16 %v1951_v29, %v1951_v29  ;;  %v1549_v34 = vadd.f32 %v3362_v59, %v1259_v31  ;;  %v1121_v35 = vpop.f32.mrf.mxu0  ;;  %v2432_v59 = vor.u32 %v2860_v9, %v2429_v37  ;;  %v2672_v31 = vor.u32 %v2920_v56, %v2669_v24 }
 0x131   : > { %v2008_v41 = vpack.c.bf16 %v1896_v30, %v1896_v30  ;;  %v1411_v40 = vadd.f32 %v1410_v44, %v1121_v35  ;;  %v2859_v44 = vld [vmem:[%s3031_s5 + $0x114] sm:$0xf0]  ;;  %v2427_v30 = vld [vmem:[%s3031_s5 + $0x120] sm:$0xf]  ;;  %v2917_v35 = vld [vmem:[%s3031_s5 + $0x2e4] sm:$0xf0] }
 0x132   : > { %2176 = vst.msk [vmem:[%s3168_s25 + $0x11c] sm:$0xf] %vm2104_vm2, %v2063_v33  ;;  %v1724_v45 = vmul.f32 %v3150_v2, %v1549_v34  ;;  %v2420_v60 = vor.u32 %v2859_v44, %v2419_v49  ;;  %v2651_v34 = vld [vmem:[%s3031_s5 + $0x2e0] sm:$0xf] }
 0x133   : > { %2121 = vst.msk [vmem:[%s3168_s25 + $0x40] sm:$0xf] %vm2104_vm2, %v2008_v41  ;;  %v1669_v38 = vmul.f32 %v3150_v2, %v1411_v40 }
 0x134   : > { %v3447_v46 = vpop.f32.mrf.mxu3  ;;  %v1840_v47 = vadd.f32 %v3156_v7, %v1724_v45 }
 0x135   : > { %v3450_v48 = vpop.f32.mrf.mxu1  ;;  %v1785_v51 = vadd.f32 %v3156_v7, %v1669_v38  ;;  %v2652_v38 = vor.u32 %v2917_v35, %v2651_v34 }
 0x136   : > { %v1952_v55 = vmax.f32 %v1840_v47, 0.0 }
 0x137   : > { %v1897_v52 = vmax.f32 %v1785_v51, 0.0  ;;  %v1261_v58 = vpop.f32.mrf.mxu2 }
 0x138   : > { %2783 = vmatmul.msk.bf16.gmra.mxu1 %vm897_vm1, %v2432_v59  ;;  %v2064_v17 = vpack.c.bf16 %v1952_v55, %v1952_v55  ;;  %v1551_v62 = vadd.f32 %v3377_v22, %v1261_v58  ;;  %v1124_v0 = vpop.f32.mrf.mxu0 }
 0x139   : > { %2812 = vmatmul.msk.bf16.gmra.mxu3 %vm897_vm1, %v2664_v50  ;;  %v2009_v36 = vpack.c.bf16 %v1897_v52, %v1897_v52  ;;  %v1414_v3 = vadd.f32 %v3415_v4, %v1124_v0 }
 0x13a   : > { %2177 = vst.msk [vmem:[%s3168_s25 + $0x120] sm:$0xf] %vm2104_vm2, %v2064_v17  ;;  %v1725_v5 = vmul.f32 %v3150_v2, %v1551_v62  ;;  %v2864_v17 = vld [vmem:[%s3031_s5 + $0x144] sm:$0xf]  ;;  %v2445_v62 = vld [vmem:[%s3031_s5 + $0x148] sm:$0xf0] }
 0x13b   : > { %2122 = vst.msk [vmem:[%s3168_s25 + $0x44] sm:$0xf] %vm2104_vm2, %v2009_v36  ;;  %v1670_v63 = vmul.f32 %v3150_v2, %v1414_v3  ;;  %1163 = vmatmul.bf16.gmra.mxu0 %v2420_v60  ;;  %v2922_v36 = vld [vmem:[%s3031_s5 + $0x314] sm:$0xf]  ;;  %v2677_v3 = vld [vmem:[%s3031_s5 + $0x318] sm:$0xf0] }
 0x13c   : > { %v3467_v22 = vpop.f32.mrf.mxu3  ;;  %v1841_v6 = vadd.f32 %v3156_v7, %v1725_v5  ;;  %1303 = vmatmul.bf16.gmra.mxu2 %v2644_v57 }
 0x13d   : > { %v1420_v4 = vpop.f32.mrf.mxu1  ;;  %v1786_v8 = vadd.f32 %v3156_v7, %v1670_v63 }
 0x13e   : > { %v1953_v10 = vmax.f32 %v1841_v6, 0.0 }
 0x13f   : > { %v1898_v11 = vmax.f32 %v1786_v8, 0.0  ;;  %v1264_v12 = vpop.f32.mrf.mxu2 }
 0x140   : > { %v2065_v14 = vpack.c.bf16 %v1953_v10, %v1953_v10  ;;  %v1554_v15 = vadd.f32 %v3397_v61, %v1264_v12  ;;  %v1126_v16 = vpop.f32.mrf.mxu0  ;;  %v2440_v61 = vor.u32 %v2862_v39, %v2437_v19  ;;  %v2680_v12 = vor.u32 %v2922_v36, %v2677_v3 }
 0x141   : > { %v2010_v21 = vpack.c.bf16 %v1898_v11, %v1898_v11  ;;  %v1416_v18 = vadd.f32 %v1415_v25, %v1126_v16  ;;  %v2861_v25 = vld [vmem:[%s3031_s5 + $0x124] sm:$0xf0]  ;;  %v2435_v11 = vld [vmem:[%s3031_s5 + $0x130] sm:$0xf]  ;;  %v2919_v16 = vld [vmem:[%s3031_s5 + $0x2f4] sm:$0xf0] }
 0x142   : > { %2178 = vst.msk [vmem:[%s3168_s25 + $0x124] sm:$0xf] %vm2104_vm2, %v2065_v14  ;;  %v1726_v26 = vmul.f32 %v3150_v2, %v1554_v15  ;;  %v2428_v40 = vor.u32 %v2861_v25, %v2427_v30  ;;  %v2659_v15 = vld [vmem:[%s3031_s5 + $0x2f0] sm:$0xf] }
 0x143   : > { %2123 = vst.msk [vmem:[%s3168_s25 + $0x48] sm:$0xf] %vm2104_vm2, %v2010_v21  ;;  %v1671_v20 = vmul.f32 %v3150_v2, %v1416_v18 }
 0x144   : > { %v3482_v27 = vpop.f32.mrf.mxu3  ;;  %v1842_v28 = vadd.f32 %v3156_v7, %v1726_v26  ;;  %v2660_v26 = vor.u32 %v2919_v16, %v2659_v15 }
 0x145   : > { %v3485_v29 = vpop.f32.mrf.mxu1  ;;  %v1787_v33 = vadd.f32 %v3156_v7, %v1671_v20 }
 0x146   : > { %v1954_v9 = vmax.f32 %v1842_v28, 0.0 }
 0x147   : > { %v1899_v37 = vmax.f32 %v1787_v33, 0.0  ;;  %v1266_v41 = vpop.f32.mrf.mxu2 }
 0x148   : > { %2784 = vmatmul.msk.bf16.gmra.mxu1 %vm897_vm1, %v2440_v61  ;;  %v2066_v23 = vpack.c.bf16 %v1954_v9, %v1954_v9  ;;  %v1556_v43 = vadd.f32 %v3412_v1, %v1266_v41  ;;  %v1129_v45 = vpop.f32.mrf.mxu0 }
 0x149   : > { %2813 = vmatmul.msk.bf16.gmra.mxu3 %vm897_vm1, %v2672_v31  ;;  %v2011_v59 = vpack.c.bf16 %v1899_v37, %v1899_v37  ;;  %v1419_v47 = vadd.f32 %v3450_v48, %v1129_v45 }
 0x14a   : > { %2179 = vst.msk [vmem:[%s3168_s25 + $0x128] sm:$0xf] %vm2104_vm2, %v2066_v23  ;;  %v1727_v49 = vmul.f32 %v3150_v2, %v1556_v43  ;;  %v2866_v23 = vld [vmem:[%s3031_s5 + $0x154] sm:$0xf]  ;;  %v2453_v43 = vld [vmem:[%s3031_s5 + $0x158] sm:$0xf0] }
 0x14b   : > { %2124 = vst.msk [vmem:[%s3168_s25 + $0x4c] sm:$0xf] %vm2104_vm2, %v2011_v59  ;;  %v1672_v44 = vmul.f32 %v3150_v2, %v1419_v47  ;;  %1168 = vmatmul.bf16.gmra.mxu0 %v2428_v40  ;;  %v2924_v59 = vld [vmem:[%s3031_s5 + $0x324] sm:$0xf]  ;;  %v2685_v47 = vld [vmem:[%s3031_s5 + $0x328] sm:$0xf0] }
 0x14c   : > { %v3502_v1 = vpop.f32.mrf.mxu3  ;;  %v1843_v50 = vadd.f32 %v3156_v7, %v1727_v49  ;;  %1308 = vmatmul.bf16.gmra.mxu2 %v2652_v38 }
 0x14d   : > { %v1425_v48 = vpop.f32.mrf.mxu1  ;;  %v1788_v51 = vadd.f32 %v3156_v7, %v1672_v44 }
 0x14e   : > { %v1955_v53 = vmax.f32 %v1843_v50, 0.0 }
 0x14f   : > { %v1900_v54 = vmax.f32 %v1788_v51, 0.0  ;;  %v1269_v55 = vpop.f32.mrf.mxu2 }
 0x150   : > { %v2067_v52 = vpack.c.bf16 %v1955_v53, %v1955_v53  ;;  %v1559_v58 = vadd.f32 %v3432_v42, %v1269_v55  ;;  %v1131_v60 = vpop.f32.mrf.mxu0  ;;  %v2448_v42 = vor.u32 %v2864_v17, %v2445_v62  ;;  %v2688_v55 = vor.u32 %v2924_v59, %v2685_v47 }
 0x151   : > { %v2012_v0 = vpack.c.bf16 %v1900_v54, %v1900_v54  ;;  %v1421_v57 = vadd.f32 %v1420_v4, %v1131_v60  ;;  %v2863_v4 = vld [vmem:[%s3031_s5 + $0x134] sm:$0xf0]  ;;  %v2443_v54 = vld [vmem:[%s3031_s5 + $0x140] sm:$0xf]  ;;  %v2921_v60 = vld [vmem:[%s3031_s5 + $0x304] sm:$0xf0] }
 0x152   : > { %2180 = vst.msk [vmem:[%s3168_s25 + $0x12c] sm:$0xf] %vm2104_vm2, %v2067_v52  ;;  %v1728_v5 = vmul.f32 %v3150_v2, %v1559_v58  ;;  %v2667_v58 = vld [vmem:[%s3031_s5 + $0x300] sm:$0xf] }
 0x153   : > { %2125 = vst.msk [vmem:[%s3168_s25 + $0x50] sm:$0xf] %vm2104_vm2, %v2012_v0  ;;  %v1673_v63 = vmul.f32 %v3150_v2, %v1421_v57  ;;  %v2436_v2 = vor.u32 %v2863_v4, %v2435_v11 }
 0x154   : > { %v3517_v6 = vpop.f32.mrf.mxu3  ;;  %v1844_v8 = vadd.f32 %v3156_v7, %v1728_v5 }
 0x155   : > { %v3520_v10 = vpop.f32.mrf.mxu1  ;;  %v1789_v14 = vadd.f32 %v3156_v7, %v1673_v63  ;;  %v3536_v7 = vld [vmem:[%s3985_s2] ss:$0 sm:$0xff]  ;;  %v2668_v63 = vor.u32 %v2921_v60, %v2667_v58 }
 0x156   : > { %v1956_v39 = vmax.f32 %v1844_v8, 0.0 }
 0x157   : > { %v1901_v19 = vmax.f32 %v1789_v14, 0.0  ;;  %v1271_v21 = vpop.f32.mrf.mxu2 }
 0x158   : > { %2785 = vmatmul.msk.bf16.gmra.mxu1 %vm897_vm1, %v2448_v42  ;;  %v2068_v18 = vpack.c.bf16 %v1956_v39, %v1956_v39  ;;  %v1561_v56 = vadd.f32 %v3447_v46, %v1271_v21  ;;  %v1134_v24 = vpop.f32.mrf.mxu0 }
 0x159   : > { %2814 = vmatmul.msk.bf16.gmra.mxu3 %vm897_vm1, %v2680_v12  ;;  %v2013_v20 = vpack.c.bf16 %v1901_v19, %v1901_v19  ;;  %v1424_v61 = vadd.f32 %v3485_v29, %v1134_v24  ;;  %v3547_v29 = vld [vmem:[%s3986_s3] ss:$0 sm:$0xff] }
 0x15a   : > { %2181 = vst.msk [vmem:[%s3168_s25 + $0x130] sm:$0xf] %vm2104_vm2, %v2068_v18  ;;  %v1729_v28 = vmul.f32 %v3536_v7, %v1561_v56  ;;  %v2868_v18 = vld [vmem:[%s3031_s5 + $0x164] sm:$0xf]  ;;  %v2461_v56 = vld [vmem:[%s3031_s5 + $0x168] sm:$0xf0] }
 0x15b   : > { %2126 = vst.msk [vmem:[%s3168_s25 + $0x54] sm:$0xf] %vm2104_vm2, %v2013_v20  ;;  %v1674_v46 = vmul.f32 %v3536_v7, %v1424_v61  ;;  %1173 = vmatmul.bf16.gmra.mxu0 %v2436_v2  ;;  %v2926_v20 = vld [vmem:[%s3031_s5 + $0x334] sm:$0xf]  ;;  %v2693_v61 = vld [vmem:[%s3031_s5 + $0x338] sm:$0xf0] }
 0x15c   : > { %v3542_v30 = vpop.f32.mrf.mxu3  ;;  %v1845_v25 = vadd.f32 %v3547_v29, %v1729_v28  ;;  %1313 = vmatmul.bf16.gmra.mxu2 %v2660_v26 }
 0x15d   : > { %v1430_v31 = vpop.f32.mrf.mxu1  ;;  %v1790_v33 = vadd.f32 %v3547_v29, %v1674_v46 }
 0x15e   : > { %v1957_v34 = vmax.f32 %v1845_v25, 0.0 }
 0x15f   : > { %v1902_v35 = vmax.f32 %v1790_v33, 0.0  ;;  %v1274_v9 = vpop.f32.mrf.mxu2 }
 0x160   : > { %v2069_v37 = vpack.c.bf16 %v1957_v34, %v1957_v34  ;;  %v1564_v41 = vadd.f32 %v3467_v22, %v1274_v9  ;;  %v1136_v40 = vpop.f32.mrf.mxu0  ;;  %v2456_v22 = vor.u32 %v2866_v23, %v2453_v43  ;;  %v2696_v9 = vor.u32 %v2926_v20, %v2693_v61 }
 0x161   : > { %v2014_v45 = vpack.c.bf16 %v1902_v35, %v1902_v35  ;;  %v1426_v38 = vadd.f32 %v1425_v48, %v1136_v40  ;;  %v2865_v48 = vld [vmem:[%s3031_s5 + $0x144] sm:$0xf0]  ;;  %v2451_v35 = vld [vmem:[%s3031_s5 + $0x150] sm:$0xf]  ;;  %v2923_v40 = vld [vmem:[%s3031_s5 + $0x314] sm:$0xf0] }
 0x162   : > { %2182 = vst.msk [vmem:[%s3168_s25 + $0x134] sm:$0xf] %vm2104_vm2, %v2069_v37  ;;  %v1730_v49 = vmul.f32 %v3536_v7, %v1564_v41  ;;  %v2444_v57 = vor.u32 %v2865_v48, %v2443_v54  ;;  %v2675_v41 = vld [vmem:[%s3031_s5 + $0x310] sm:$0xf] }
 0x163   : > { %2127 = vst.msk [vmem:[%s3168_s25 + $0x58] sm:$0xf] %vm2104_vm2, %v2014_v45  ;;  %v1675_v44 = vmul.f32 %v3536_v7, %v1426_v38 }
 0x164   : > { %v3562_v50 = vpop.f32.mrf.mxu3  ;;  %v1846_v51 = vadd.f32 %v3547_v29, %v1730_v49 }
 0x165   : > { %v3565_v53 = vpop.f32.mrf.mxu1  ;;  %v1791_v52 = vadd.f32 %v3547_v29, %v1675_v44  ;;  %v2676_v44 = vor.u32 %v2923_v40, %v2675_v41 }
 0x166   : > { %v1958_v17 = vmax.f32 %v1846_v51, 0.0 }
 0x167   : > { %v1903_v62 = vmax.f32 %v1791_v52, 0.0  ;;  %v1276_v0 = vpop.f32.mrf.mxu2 }
 0x168   : > { %2786 = vmatmul.msk.bf16.gmra.mxu1 %vm897_vm1, %v2456_v22  ;;  %v2070_v36 = vpack.c.bf16 %v1958_v17, %v1958_v17  ;;  %v1566_v3 = vadd.f32 %v3482_v27, %v1276_v0  ;;  %v1139_v5 = vpop.f32.mrf.mxu0 }
 0x169   : > { %2815 = vmatmul.msk.bf16.gmra.mxu3 %vm897_vm1, %v2688_v55  ;;  %v2015_v42 = vpack.c.bf16 %v1903_v62, %v1903_v62  ;;  %v1429_v8 = vadd.f32 %v3520_v10, %v1139_v5 }
 0x16a   : > { %2183 = vst.msk [vmem:[%s3168_s25 + $0x138] sm:$0xf] %vm2104_vm2, %v2070_v36  ;;  %v1731_v11 = vmul.f32 %v3536_v7, %v1566_v3  ;;  %v2870_v36 = vld [vmem:[%s3031_s5 + $0x174] sm:$0xf]  ;;  %v2469_v3 = vld [vmem:[%s3031_s5 + $0x178] sm:$0xf0] }
 0x16b   : > { %2128 = vst.msk [vmem:[%s3168_s25 + $0x5c] sm:$0xf] %vm2104_vm2, %v2015_v42  ;;  %v1676_v4 = vmul.f32 %v3536_v7, %v1429_v8  ;;  %1178 = vmatmul.bf16.gmra.mxu0 %v2444_v57  ;;  %v2928_v42 = vld [vmem:[%s3031_s5 + $0x344] sm:$0xf]  ;;  %v2701_v8 = vld [vmem:[%s3031_s5 + $0x348] sm:$0xf0] }
 0x16c   : > { %v3582_v27 = vpop.f32.mrf.mxu3  ;;  %v1847_v12 = vadd.f32 %v3547_v29, %v1731_v11  ;;  %1318 = vmatmul.bf16.gmra.mxu2 %v2668_v63 }
 0x16d   : > { %v1435_v10 = vpop.f32.mrf.mxu1  ;;  %v1792_v14 = vadd.f32 %v3547_v29, %v1676_v4 }
 0x16e   : > { %v1959_v15 = vmax.f32 %v1847_v12, 0.0 }
 0x16f   : > { %v1904_v16 = vmax.f32 %v1792_v14, 0.0  ;;  %v1279_v39 = vpop.f32.mrf.mxu2 }
 0x170   : > { %v2071_v19 = vpack.c.bf16 %v1959_v15, %v1959_v15  ;;  %v1569_v21 = vadd.f32 %v3502_v1, %v1279_v39  ;;  %v1141_v2 = vpop.f32.mrf.mxu0  ;;  %v2464_v1 = vor.u32 %v2868_v18, %v2461_v56  ;;  %v2704_v39 = vor.u32 %v2928_v42, %v2701_v8 }
 0x171   : > { %v2016_v24 = vpack.c.bf16 %v1904_v16, %v1904_v16  ;;  %v1431_v26 = vadd.f32 %v1430_v31, %v1141_v2  ;;  %v2867_v31 = vld [vmem:[%s3031_s5 + $0x154] sm:$0xf0]  ;;  %v2459_v16 = vld [vmem:[%s3031_s5 + $0x160] sm:$0xf]  ;;  %v2925_v2 = vld [vmem:[%s3031_s5 + $0x324] sm:$0xf0] }
 0x172   : > { %2184 = vst.msk [vmem:[%s3168_s25 + $0x13c] sm:$0xf] %vm2104_vm2, %v2071_v19  ;;  %v1732_v28 = vmul.f32 %v3536_v7, %v1569_v21  ;;  %v2452_v38 = vor.u32 %v2867_v31, %v2451_v35  ;;  %v2683_v21 = vld [vmem:[%s3031_s5 + $0x320] sm:$0xf] }
 0x173   : > { %2129 = vst.msk [vmem:[%s3168_s25 + $0x60] sm:$0xf] %vm2104_vm2, %v2016_v24  ;;  %v1677_v46 = vmul.f32 %v3536_v7, %v1431_v26 }
 0x174   : > { %v3597_v25 = vpop.f32.mrf.mxu3  ;;  %v1848_v33 = vadd.f32 %v3547_v29, %v1732_v28 }
 0x175   : > { %v3600_v34 = vpop.f32.mrf.mxu1  ;;  %v1793_v37 = vadd.f32 %v3547_v29, %v1677_v46  ;;  %v2684_v46 = vor.u32 %v2925_v2, %v2683_v21 }
 0x176   : > { %v1960_v23 = vmax.f32 %v1848_v33, 0.0 }
 0x177   : > { %v1905_v43 = vmax.f32 %v1793_v37, 0.0  ;;  %v1281_v45 = vpop.f32.mrf.mxu2 }
 0x178   : > { %2787 = vmatmul.msk.bf16.gmra.mxu1 %vm897_vm1, %v2464_v1  ;;  %v2072_v59 = vpack.c.bf16 %v1960_v23, %v1960_v23  ;;  %v1571_v47 = vadd.f32 %v3517_v6, %v1281_v45  ;;  %v1144_v49 = vpop.f32.mrf.mxu0 }
 0x179   : > { %2816 = vmatmul.msk.bf16.gmra.mxu3 %vm897_vm1, %v2696_v9  ;;  %v2017_v22 = vpack.c.bf16 %v1905_v43, %v1905_v43  ;;  %v1434_v51 = vadd.f32 %v3565_v53, %v1144_v49 }
 0x17a   : > { %2185 = vst.msk [vmem:[%s3168_s25 + $0x140] sm:$0xf] %vm2104_vm2, %v2072_v59  ;;  %v1733_v54 = vmul.f32 %v3536_v7, %v1571_v47  ;;  %v2872_v59 = vld [vmem:[%s3031_s5 + $0x184] sm:$0xf]  ;;  %v2477_v47 = vld [vmem:[%s3031_s5 + $0x188] sm:$0xf0] }
 0x17b   : > { %2130 = vst.msk [vmem:[%s3168_s25 + $0x64] sm:$0xf] %vm2104_vm2, %v2017_v22  ;;  %v1678_v48 = vmul.f32 %v3536_v7, %v1434_v51  ;;  %1183 = vmatmul.bf16.gmra.mxu0 %v2452_v38  ;;  %v2930_v22 = vld [vmem:[%s3031_s5 + $0x354] sm:$0xf]  ;;  %v2709_v51 = vld [vmem:[%s3031_s5 + $0x358] sm:$0xf0] }
 0x17c   : > { %v3617_v6 = vpop.f32.mrf.mxu3  ;;  %v1849_v55 = vadd.f32 %v3547_v29, %v1733_v54  ;;  %1323 = vmatmul.bf16.gmra.mxu2 %v2676_v44 }
 0x17d   : > { %v1440_v53 = vpop.f32.mrf.mxu1  ;;  %v1794_v52 = vadd.f32 %v3547_v29, %v1678_v48 }
 0x17e   : > { %v1961_v58 = vmax.f32 %v1849_v55, 0.0 }
 0x17f   : > { %v1906_v60 = vmax.f32 %v1794_v52, 0.0  ;;  %v1284_v17 = vpop.f32.mrf.mxu2 }
 0x180   : > { %v2073_v62 = vpack.c.bf16 %v1961_v58, %v1961_v58  ;;  %v1574_v0 = vadd.f32 %v3542_v30, %v1284_v17  ;;  %v1146_v57 = vpop.f32.mrf.mxu0  ;;  %v2472_v30 = vor.u32 %v2870_v36, %v2469_v3  ;;  %v2712_v17 = vor.u32 %v2930_v22, %v2709_v51 }
 0x181   : > { %v2018_v5 = vpack.c.bf16 %v1906_v60, %v1906_v60  ;;  %v1436_v63 = vadd.f32 %v1435_v10, %v1146_v57  ;;  %v2869_v10 = vld [vmem:[%s3031_s5 + $0x164] sm:$0xf0]  ;;  %v2467_v60 = vld [vmem:[%s3031_s5 + $0x170] sm:$0xf]  ;;  %v2927_v57 = vld [vmem:[%s3031_s5 + $0x334] sm:$0xf0] }
 0x182   : > { %2186 = vst.msk [vmem:[%s3168_s25 + $0x144] sm:$0xf] %vm2104_vm2, %v2073_v62  ;;  %v1734_v11 = vmul.f32 %v3536_v7, %v1574_v0  ;;  %v2460_v26 = vor.u32 %v2869_v10, %v2459_v16  ;;  %v2691_v0 = vld [vmem:[%s3031_s5 + $0x330] sm:$0xf] }
 0x183   : > { %2131 = vst.msk [vmem:[%s3168_s25 + $0x68] sm:$0xf] %vm2104_vm2, %v2018_v5  ;;  %v1679_v4 = vmul.f32 %v3536_v7, %v1436_v63 }
 0x184   : > { %v3632_v12 = vpop.f32.mrf.mxu3  ;;  %v1850_v14 = vadd.f32 %v3547_v29, %v1734_v11 }
 0x185   : > { %v3635_v15 = vpop.f32.mrf.mxu1  ;;  %v1795_v19 = vadd.f32 %v3547_v29, %v1679_v4  ;;  %v2692_v4 = vor.u32 %v2927_v57, %v2691_v0 }
 0x186   : > { %v1962_v18 = vmax.f32 %v1850_v14, 0.0 }
 0x187   : > { %v1907_v56 = vmax.f32 %v1795_v19, 0.0  ;;  %v1286_v24 = vpop.f32.mrf.mxu2 }
 0x188   : > { %2788 = vmatmul.msk.bf16.gmra.mxu1 %vm897_vm1, %v2472_v30  ;;  %v2074_v20 = vpack.c.bf16 %v1962_v18, %v1962_v18  ;;  %v1576_v61 = vadd.f32 %v3562_v50, %v1286_v24  ;;  %v1149_v28 = vpop.f32.mrf.mxu0 }
 0x189   : > { %2817 = vmatmul.msk.bf16.gmra.mxu3 %vm897_vm1, %v2704_v39  ;;  %v2019_v1 = vpack.c.bf16 %v1907_v56, %v1907_v56  ;;  %v1439_v33 = vadd.f32 %v3600_v34, %v1149_v28 }
 0x18a   : > { %2187 = vst.msk [vmem:[%s3168_s25 + $0x148] sm:$0xf] %vm2104_vm2, %v2074_v20  ;;  %v1735_v35 = vmul.f32 %v3536_v7, %v1576_v61  ;;  %v2874_v20 = vld [vmem:[%s3031_s5 + $0x194] sm:$0xf]  ;;  %v2485_v61 = vld [vmem:[%s3031_s5 + $0x198] sm:$0xf0] }
 0x18b   : > { %2132 = vst.msk [vmem:[%s3168_s25 + $0x6c] sm:$0xf] %vm2104_vm2, %v2019_v1  ;;  %v1680_v31 = vmul.f32 %v3536_v7, %v1439_v33  ;;  %1188 = vmatmul.bf16.gmra.mxu0 %v2460_v26  ;;  %v2932_v1 = vld [vmem:[%s3031_s5 + $0x364] sm:$0xf]  ;;  %v2717_v33 = vld [vmem:[%s3031_s5 + $0x368] sm:$0xf0] }
 0x18c   : > { %v3652_v50 = vpop.f32.mrf.mxu3  ;;  %v1851_v9 = vadd.f32 %v3547_v29, %v1735_v35  ;;  %1328 = vmatmul.bf16.gmra.mxu2 %v2684_v46 }
 0x18d   : > { %v1445_v34 = vpop.f32.mrf.mxu1  ;;  %v1796_v37 = vadd.f32 %v3547_v29, %v1680_v31 }
 0x18e   : > { %v1963_v41 = vmax.f32 %v1851_v9, 0.0 }
 0x18f   : > { %v1908_v40 = vmax.f32 %v1796_v37, 0.0  ;;  %v1289_v23 = vpop.f32.mrf.mxu2 }
 0x190   : > { %v2075_v43 = vpack.c.bf16 %v1963_v41, %v1963_v41  ;;  %v1579_v45 = vadd.f32 %v3582_v27, %v1289_v23  ;;  %v1151_v38 = vpop.f32.mrf.mxu0  ;;  %v2480_v27 = vor.u32 %v2872_v59, %v2477_v47  ;;  %v2720_v23 = vor.u32 %v2932_v1, %v2717_v33 }
 0x191   : > { %v2020_v49 = vpack.c.bf16 %v1908_v40, %v1908_v40  ;;  %v1441_v44 = vadd.f32 %v1440_v53, %v1151_v38  ;;  %v2871_v53 = vld [vmem:[%s3031_s5 + $0x174] sm:$0xf0]  ;;  %v2475_v40 = vld [vmem:[%s3031_s5 + $0x180] sm:$0xf]  ;;  %v2929_v38 = vld [vmem:[%s3031_s5 + $0x344] sm:$0xf0] }
 0x192   : > { %2188 = vst.msk [vmem:[%s3168_s25 + $0x14c] sm:$0xf] %vm2104_vm2, %v2075_v43  ;;  %v1736_v54 = vmul.f32 %v3536_v7, %v1579_v45  ;;  %v2468_v63 = vor.u32 %v2871_v53, %v2467_v60  ;;  %v2699_v45 = vld [vmem:[%s3031_s5 + $0x340] sm:$0xf] }
 0x193   : > { %2133 = vst.msk [vmem:[%s3168_s25 + $0x70] sm:$0xf] %vm2104_vm2, %v2020_v49  ;;  %v1681_v48 = vmul.f32 %v3536_v7, %v1441_v44 }
 0x194   : > { %v3667_v55 = vpop.f32.mrf.mxu3  ;;  %v1852_v52 = vadd.f32 %v3547_v29, %v1736_v54 }
 0x195   : > { %v3670_v58 = vpop.f32.mrf.mxu1  ;;  %v1797_v62 = vadd.f32 %v3547_v29, %v1681_v48  ;;  %v2700_v48 = vor.u32 %v2929_v38, %v2699_v45 }
 0x196   : > { %v1964_v36 = vmax.f32 %v1852_v52, 0.0 }
 0x197   : > { %v1909_v3 = vmax.f32 %v1797_v62, 0.0  ;;  %v1291_v5 = vpop.f32.mrf.mxu2 }
 0x198   : > { %2789 = vmatmul.msk.bf16.gmra.mxu1 %vm897_vm1, %v2480_v27  ;;  %v2076_v42 = vpack.c.bf16 %v1964_v36, %v1964_v36  ;;  %v1581_v8 = vadd.f32 %v3597_v25, %v1291_v5  ;;  %v1154_v11 = vpop.f32.mrf.mxu0 }
 0x199   : > { %2818 = vmatmul.msk.bf16.gmra.mxu3 %vm897_vm1, %v2712_v17  ;;  %v2021_v30 = vpack.c.bf16 %v1909_v3, %v1909_v3  ;;  %v1444_v14 = vadd.f32 %v3635_v15, %v1154_v11 }
 0x19a   : > { %2189 = vst.msk [vmem:[%s3168_s25 + $0x150] sm:$0xf] %vm2104_vm2, %v2076_v42  ;;  %v1737_v16 = vmul.f32 %v3536_v7, %v1581_v8  ;;  %v2876_v42 = vld [vmem:[%s3031_s5 + $0x1a4] sm:$0xf]  ;;  %v2493_v8 = vld [vmem:[%s3031_s5 + $0x1a8] sm:$0xf0] }
 0x19b   : > { %2134 = vst.msk [vmem:[%s3168_s25 + $0x74] sm:$0xf] %vm2104_vm2, %v2021_v30  ;;  %v1682_v10 = vmul.f32 %v3536_v7, %v1444_v14  ;;  %1193 = vmatmul.bf16.gmra.mxu0 %v2468_v63  ;;  %v2934_v30 = vld [vmem:[%s3031_s5 + $0x374] sm:$0xf]  ;;  %v2725_v14 = vld [vmem:[%s3031_s5 + $0x378] sm:$0xf0] }
 0x19c   : > { %v3687_v25 = vpop.f32.mrf.mxu3  ;;  %v1853_v39 = vadd.f32 %v3547_v29, %v1737_v16  ;;  %1333 = vmatmul.bf16.gmra.mxu2 %v2692_v4 }
 0x19d   : > { %v1450_v15 = vpop.f32.mrf.mxu1  ;;  %v1798_v19 = vadd.f32 %v3547_v29, %v1682_v10 }
 0x19e   : > { %v1965_v21 = vmax.f32 %v1853_v39, 0.0 }
 0x19f   : > { %v1910_v2 = vmax.f32 %v1798_v19, 0.0  ;;  %v1294_v18 = vpop.f32.mrf.mxu2 }
 0x1a0   : > { %v2077_v56 = vpack.c.bf16 %v1965_v21, %v1965_v21  ;;  %v1584_v24 = vadd.f32 %v3617_v6, %v1294_v18  ;;  %v1156_v26 = vpop.f32.mrf.mxu0  ;;  %v2488_v6 = vor.u32 %v2874_v20, %v2485_v61  ;;  %v2875_v18 = vld [vmem:[%s3031_s5 + $0x194] sm:$0xf0] }
 0x1a1   : > { %v2022_v28 = vpack.c.bf16 %v1910_v2, %v1910_v2  ;;  %v1446_v46 = vadd.f32 %v1445_v34, %v1156_v26  ;;  %v2873_v34 = vld [vmem:[%s3031_s5 + $0x184] sm:$0xf0]  ;;  %v2483_v2 = vld [vmem:[%s3031_s5 + $0x190] sm:$0xf]  ;;  %v2931_v26 = vld [vmem:[%s3031_s5 + $0x354] sm:$0xf0] }
 0x1a2   : > { %2190 = vst.msk [vmem:[%s3168_s25 + $0x154] sm:$0xf] %vm2104_vm2, %v2077_v56  ;;  %v1738_v35 = vmul.f32 %v3536_v7, %v1584_v24  ;;  %v2476_v44 = vor.u32 %v2873_v34, %v2475_v40  ;;  %v2707_v24 = vld [vmem:[%s3031_s5 + $0x350] sm:$0xf] }
 0x1a3   : > { %2135 = vst.msk [vmem:[%s3168_s25 + $0x78] sm:$0xf] %vm2104_vm2, %v2022_v28  ;;  %v1683_v31 = vmul.f32 %v3536_v7, %v1446_v46  ;;  %v2484_v46 = vor.u32 %v2875_v18, %v2483_v2 }
 0x1a4   : > { %v3702_v9 = vpop.f32.mrf.mxu3  ;;  %v1854_v37 = vadd.f32 %v3547_v29, %v1738_v35 }
 0x1a5   : > { %v3705_v41 = vpop.f32.mrf.mxu1  ;;  %v1799_v43 = vadd.f32 %v3547_v29, %v1683_v31  ;;  %v2708_v31 = vor.u32 %v2931_v26, %v2707_v24 }
 0x1a6   : > { %v1966_v59 = vmax.f32 %v1854_v37, 0.0 }
 0x1a7   : > { %v1911_v47 = vmax.f32 %v1799_v43, 0.0  ;;  %v1296_v49 = vpop.f32.mrf.mxu2 }
 0x1a8   : > { %2790 = vmatmul.msk.bf16.gmra.mxu1 %vm897_vm1, %v2488_v6  ;;  %v2078_v22 = vpack.c.bf16 %v1966_v59, %v1966_v59  ;;  %v1586_v51 = vadd.f32 %v3632_v12, %v1296_v49  ;;  %v1159_v54 = vpop.f32.mrf.mxu0 }
 0x1a9   : > { %2819 = vmatmul.msk.bf16.gmra.mxu3 %vm897_vm1, %v2720_v23  ;;  %v2023_v27 = vpack.c.bf16 %v1911_v47, %v1911_v47  ;;  %v1449_v52 = vadd.f32 %v3670_v58, %v1159_v54 }
 0x1aa   : > { %2191 = vst.msk [vmem:[%s3168_s25 + $0x158] sm:$0xf] %vm2104_vm2, %v2078_v22  ;;  %v1739_v60 = vmul.f32 %v3536_v7, %v1586_v51  ;;  %v2878_v22 = vld [vmem:[%s3031_s5 + $0x1b4] sm:$0xf]  ;;  %v2501_v51 = vld [vmem:[%s3031_s5 + $0x1b8] sm:$0xf0] }
 0x1ab   : > { %2136 = vst.msk [vmem:[%s3168_s25 + $0x7c] sm:$0xf] %vm2104_vm2, %v2023_v27  ;;  %v1684_v53 = vmul.f32 %v3536_v7, %v1449_v52  ;;  %1198 = vmatmul.bf16.gmra.mxu0 %v2476_v44 }
 0x1ac   : > { %v3722_v12 = vpop.f32.mrf.mxu3  ;;  %v1855_v17 = vadd.f32 %v3547_v29, %v1739_v60  ;;  %1338 = vmatmul.bf16.gmra.mxu2 %v2700_v48  ;;  %v2504_v60 = vor.u32 %v2878_v22, %v2501_v51 }
 0x1ad   : > { %v1455_v58 = vpop.f32.mrf.mxu1  ;;  %v1800_v62 = vadd.f32 %v3547_v29, %v1684_v53 }
 0x1ae   : > { %v1967_v0 = vmax.f32 %v1855_v17, 0.0 }
 0x1af   : > { %v1912_v57 = vmax.f32 %v1800_v62, 0.0  ;;  %v1299_v36 = vpop.f32.mrf.mxu2  ;;  %v2877_v62 = vld [vmem:[%s3031_s5 + $0x1a4] sm:$0xf0] }
 0x1b0   : > { %v2079_v3 = vpack.c.bf16 %v1967_v0, %v1967_v0  ;;  %v1589_v5 = vadd.f32 %v3652_v50, %v1299_v36  ;;  %v1161_v63 = vpop.f32.mrf.mxu0  ;;  %v2496_v50 = vor.u32 %v2876_v42, %v2493_v8 }
 0x1b1   : > { %v2024_v11 = vpack.c.bf16 %v1912_v57, %v1912_v57  ;;  %v1451_v4 = vadd.f32 %v1450_v15, %v1161_v63  ;;  %v2728_v15 = vor.u32 %v2934_v30, %v2725_v14  ;;  %v2715_v57 = vld [vmem:[%s3031_s5 + $0x360] sm:$0xf] }
 0x1b2   : > { %2192 = vst.msk [vmem:[%s3168_s25 + $0x15c] sm:$0xf] %vm2104_vm2, %v2079_v3  ;;  %v1740_v16 = vmul.f32 %v3536_v7, %v1589_v5 }
 0x1b3   : > { %2137 = vst.msk [vmem:[%s3168_s25 + $0x80] sm:$0xf] %vm2104_vm2, %v2024_v11  ;;  %v1685_v10 = vmul.f32 %v3536_v7, %v1451_v4 }
 0x1b4   : > { %v3737_v39 = vpop.f32.mrf.mxu3  ;;  %v1856_v19 = vadd.f32 %v3547_v29, %v1740_v16 }
 0x1b5   : > { %v1458_v21 = vpop.f32.mrf.mxu1  ;;  %v1801_v56 = vadd.f32 %v3547_v29, %v1685_v10 }
 0x1b6   : > { %v1968_v20 = vmax.f32 %v1856_v19, 0.0 }
 0x1b7   : > { %v1913_v61 = vmax.f32 %v1801_v56, 0.0  ;;  %v1301_v28 = vpop.f32.mrf.mxu2 }
 0x1b8   : > { %2791 = vmatmul.msk.bf16.gmra.mxu1 %vm897_vm1, %v2496_v50  ;;  %v2080_v1 = vpack.c.bf16 %v1968_v20, %v1968_v20  ;;  %v1591_v33 = vadd.f32 %v3667_v55, %v1301_v28  ;;  %v1164_v35 = vpop.f32.mrf.mxu0  ;;  %v2880_v20 = vld [vmem:[%s3031_s5 + $0x1c4] sm:$0xf] }
 0x1b9   : > { %2820 = vmatmul.msk.bf16.gmra.mxu3 %vm897_vm1, %v2728_v15  ;;  %v2025_v6 = vpack.c.bf16 %v1913_v61, %v1913_v61  ;;  %v1454_v37 = vadd.f32 %v3705_v41, %v1164_v35  ;;  %v2509_v61 = vld [vmem:[%s3031_s5 + $0x1c8] sm:$0xf0] }
 0x1ba   : > { %2193 = vst.msk [vmem:[%s3168_s25 + $0x160] sm:$0xf] %vm2104_vm2, %v2080_v1  ;;  %v1741_v40 = vmul.f32 %v3536_v7, %v1591_v33 }
 0x1bb   : > { %2138 = vst.msk [vmem:[%s3168_s25 + $0x84] sm:$0xf] %vm2104_vm2, %v2025_v6  ;;  %v1686_v34 = vmul.f32 %v3536_v7, %v1454_v37  ;;  %1203 = vmatmul.bf16.gmra.mxu0 %v2484_v46  ;;  %v2499_v37 = vld [vmem:[%s3031_s5 + $0x1b0] sm:$0xf] }
 0x1bc   : > { %v1857_v55 = vadd.f32 %v3547_v29, %v1741_v40  ;;  %1343 = vmatmul.bf16.gmra.mxu2 %v2708_v31  ;;  %v3757_v41 = vpop.f32.mrf.mxu3  ;;  %v2512_v31 = vor.u32 %v2880_v20, %v2509_v61  ;;  %v2879_v40 = vld [vmem:[%s3031_s5 + $0x1b4] sm:$0xf0] }
 0x1bd   : > { %v1460_v23 = vpop.f32.mrf.mxu1  ;;  %v1802_v43 = vadd.f32 %v3547_v29, %v1686_v34 }
 0x1be   : > { %v1969_v45 = vmax.f32 %v1857_v55, 0.0  ;;  %v2723_v55 = vld [vmem:[%s3031_s5 + $0x370] sm:$0xf] }
 0x1bf   : > { %v1914_v38 = vmax.f32 %v1802_v43, 0.0  ;;  %v1304_v59 = vpop.f32.mrf.mxu2 }
 0x1c0   : > { %v2081_v47 = vpack.c.bf16 %v1969_v45, %v1969_v45  ;;  %v1594_v49 = vadd.f32 %v3687_v25, %v1304_v59  ;;  %v1166_v44 = vpop.f32.mrf.mxu0  ;;  %v2491_v25 = vld [vmem:[%s3031_s5 + $0x1a0] sm:$0xf]  ;;  %v2500_v59 = vor.u32 %v2879_v40, %v2499_v37 }
 0x1c1   : > { %v2026_v54 = vpack.c.bf16 %v1914_v38, %v1914_v38  ;;  %v1456_v48 = vadd.f32 %v1455_v58, %v1166_v44  ;;  %v2933_v58 = vld [vmem:[%s3031_s5 + $0x364] sm:$0xf0]  ;;  %v2492_v63 = vor.u32 %v2877_v62, %v2491_v25 }
 0x1c2   : > { %2194 = vst.msk [vmem:[%s3168_s25 + $0x164] sm:$0xf] %vm2104_vm2, %v2081_v47  ;;  %v1742_v27 = vmul.f32 %v3536_v7, %v1594_v49  ;;  %v2716_v30 = vor.u32 %v2933_v58, %v2715_v57 }
 0x1c3   : > { %2139 = vst.msk [vmem:[%s3168_s25 + $0x88] sm:$0xf] %vm2104_vm2, %v2026_v54  ;;  %v1687_v52 = vmul.f32 %v3536_v7, %v1456_v48 }
 0x1c4   : > { %v1858_v53 = vadd.f32 %v3547_v29, %v1742_v27  ;;  %v3775_v42 = vpop.f32.mrf.mxu3 }
 0x1c5   : > { %v1463_v17 = vpop.f32.mrf.mxu1  ;;  %v1803_v0 = vadd.f32 %v3547_v29, %v1687_v52 }
 0x1c6   : > { %v1970_v36 = vmax.f32 %v1858_v53, 0.0 }
 0x1c7   : > { %v1915_v3 = vmax.f32 %v1803_v0, 0.0  ;;  %v1306_v5 = vpop.f32.mrf.mxu2 }
 0x1c8   : > { %2792 = vmatmul.msk.bf16.gmra.mxu1 %vm897_vm1, %v2504_v60  ;;  %v2082_v8 = vpack.c.bf16 %v1970_v36, %v1970_v36  ;;  %v1596_v11 = vadd.f32 %v3702_v9, %v1306_v5  ;;  %v1169_v4 = vpop.f32.mrf.mxu0 }
 0x1c9   : > { %v2027_v14 = vpack.c.bf16 %v1915_v3, %v1915_v3  ;;  %v1459_v16 = vadd.f32 %v1458_v21, %v1169_v4 }
 0x1ca   : > { %2195 = vst.msk [vmem:[%s3168_s25 + $0x168] sm:$0xf] %vm2104_vm2, %v2082_v8  ;;  %v1743_v10 = vmul.f32 %v3536_v7, %v1596_v11 }
 0x1cb   : > { %2140 = vst.msk [vmem:[%s3168_s25 + $0x8c] sm:$0xf] %vm2104_vm2, %v2027_v14  ;;  %v1688_v50 = vmul.f32 %v3536_v7, %v1459_v16  ;;  %1208 = vmatmul.bf16.gmra.mxu0 %v2492_v63 }
 0x1cc   : > { %v1859_v19 = vadd.f32 %v3547_v29, %v1743_v10  ;;  %1348 = vmatmul.bf16.gmra.mxu2 %v2716_v30  ;;  %v3789_v1 = vpop.f32.mrf.mxu3 }
 0x1cd   : > { %v1465_v9 = vpop.f32.mrf.mxu1  ;;  %v1804_v2 = vadd.f32 %v3547_v29, %v1688_v50 }
 0x1ce   : > { %v1971_v21 = vmax.f32 %v1859_v19, 0.0 }
 0x1cf   : > { %v1916_v18 = vmax.f32 %v1804_v2, 0.0  ;;  %v1309_v15 = vpop.f32.mrf.mxu2 }
 0x1d0   : > { %v2083_v56 = vpack.c.bf16 %v1971_v21, %v1971_v21  ;;  %v1599_v24 = vadd.f32 %v3722_v12, %v1309_v15  ;;  %v1171_v26 = vpop.f32.mrf.mxu0 }
 0x1d1   : > { %v2028_v28 = vpack.c.bf16 %v1916_v18, %v1916_v18  ;;  %v1461_v46 = vadd.f32 %v1460_v23, %v1171_v26  ;;  %v2935_v23 = vld [vmem:[%s3031_s5 + $0x374] sm:$0xf0] }
 0x1d2   : > { %2196 = vst.msk [vmem:[%s3168_s25 + $0x16c] sm:$0xf] %vm2104_vm2, %v2083_v56  ;;  %v1744_v33 = vmul.f32 %v3536_v7, %v1599_v24  ;;  %v2724_v22 = vor.u32 %v2935_v23, %v2723_v55 }
 0x1d3   : > { %2141 = vst.msk [vmem:[%s3168_s25 + $0x90] sm:$0xf] %vm2104_vm2, %v2028_v28  ;;  %v1689_v35 = vmul.f32 %v3536_v7, %v1461_v46 }
 0x1d4   : > { %v1860_v12 = vadd.f32 %v3547_v29, %v1744_v33  ;;  %v1610_v52 = vpop.f32.mrf.mxu3 }
 0x1d5   : > { %v1468_v6 = vpop.f32.mrf.mxu1  ;;  %v1805_v34 = vadd.f32 %v3547_v29, %v1689_v35 }
 0x1d6   : > { %v1972_v43 = vmax.f32 %v1860_v12, 0.0 }
 0x1d7   : > { %v1917_v45 = vmax.f32 %v1805_v34, 0.0  ;;  %v1311_v38 = vpop.f32.mrf.mxu2 }
 0x1d8   : > { %2793 = vmatmul.msk.bf16.gmra.mxu1 %vm897_vm1, %v2512_v31  ;;  %v2084_v47 = vpack.c.bf16 %v1972_v43, %v1972_v43  ;;  %v1601_v49 = vadd.f32 %v3737_v39, %v1311_v38  ;;  %v1174_v44 = vpop.f32.mrf.mxu0 }
 0x1d9   : > { %v2029_v51 = vpack.c.bf16 %v1917_v45, %v1917_v45  ;;  %v1464_v54 = vadd.f32 %v1463_v17, %v1174_v44 }
 0x1da   : > { %2197 = vst.msk [vmem:[%s3168_s25 + $0x170] sm:$0xf] %vm2104_vm2, %v2084_v47  ;;  %v1745_v48 = vmul.f32 %v3536_v7, %v1601_v49 }
 0x1db   : > { %2142 = vst.msk [vmem:[%s3168_s25 + $0x94] sm:$0xf] %vm2104_vm2, %v2029_v51  ;;  %v1690_v27 = vmul.f32 %v3536_v7, %v1464_v54  ;;  %1213 = vmatmul.bf16.gmra.mxu0 %v2500_v59 }
 0x1dc   : > { %v1861_v60 = vadd.f32 %v3547_v29, %v1745_v48  ;;  %1353 = vmatmul.bf16.gmra.mxu2 %v2724_v22  ;;  %v1613_v30 = vpop.f32.mrf.mxu3 }
 0x1dd   : > { %v1470_v39 = vpop.f32.mrf.mxu1  ;;  %v1806_v53 = vadd.f32 %v3547_v29, %v1690_v27 }
 0x1de   : > { %v1973_v25 = vmax.f32 %v1861_v60, 0.0 }
 0x1df   : > { %v1918_v17 = vmax.f32 %v1806_v53, 0.0  ;;  %v1314_v62 = vpop.f32.mrf.mxu2 }
 0x1e0   : > { %v2085_v0 = vpack.c.bf16 %v1973_v25, %v1973_v25  ;;  %v1604_v57 = vadd.f32 %v3757_v41, %v1314_v62  ;;  %v1176_v58 = vpop.f32.mrf.mxu0 }
 0x1e1   : > { %v2030_v36 = vpack.c.bf16 %v1918_v17, %v1918_v17  ;;  %v1466_v3 = vadd.f32 %v1465_v9, %v1176_v58 }
 0x1e2   : > { %2198 = vst.msk [vmem:[%s3168_s25 + $0x174] sm:$0xf] %vm2104_vm2, %v2085_v0  ;;  %v1746_v5 = vmul.f32 %v3536_v7, %v1604_v57 }
 0x1e3   : > { %2143 = vst.msk [vmem:[%s3168_s25 + $0x98] sm:$0xf] %vm2104_vm2, %v2030_v36  ;;  %v1691_v63 = vmul.f32 %v3536_v7, %v1466_v3 }
 0x1e4   : > { %v1862_v8 = vadd.f32 %v3547_v29, %v1746_v5  ;;  %v1615_v61 = vpop.f32.mrf.mxu3 }
 0x1e5   : > { %v1473_v11 = vpop.f32.mrf.mxu1  ;;  %v1807_v4 = vadd.f32 %v3547_v29, %v1691_v63 }
 0x1e6   : > { %v1974_v41 = vmax.f32 %v1862_v8, 0.0 }
 0x1e7   : > { %v1919_v14 = vmax.f32 %v1807_v4, 0.0  ;;  %v1316_v16 = vpop.f32.mrf.mxu2 }
 0x1e8   : > { %v2086_v10 = vpack.c.bf16 %v1974_v41, %v1974_v41  ;;  %v1606_v50 = vadd.f32 %v3775_v42, %v1316_v16  ;;  %v1179_v19 = vpop.f32.mrf.mxu0 }
 0x1e9   : > { %v2031_v9 = vpack.c.bf16 %v1919_v14, %v1919_v14  ;;  %v1469_v2 = vadd.f32 %v1468_v6, %v1179_v19 }
 0x1ea   : > { %2199 = vst.msk [vmem:[%s3168_s25 + $0x178] sm:$0xf] %vm2104_vm2, %v2086_v10  ;;  %v1747_v21 = vmul.f32 %v3536_v7, %v1606_v50 }
 0x1eb   : > { %2144 = vst.msk [vmem:[%s3168_s25 + $0x9c] sm:$0xf] %vm2104_vm2, %v2031_v9  ;;  %v1692_v18 = vmul.f32 %v3536_v7, %v1469_v2 }
 0x1ec   : > { %v1863_v15 = vadd.f32 %v3547_v29, %v1747_v21  ;;  %v1618_v49 = vpop.f32.mrf.mxu3 }
 0x1ed   : > { %v1475_v56 = vpop.f32.mrf.mxu1  ;;  %v1808_v24 = vadd.f32 %v3547_v29, %v1692_v18 }
 0x1ee   : > { %v1975_v26 = vmax.f32 %v1863_v15, 0.0 }
 0x1ef   : > { %v1920_v42 = vmax.f32 %v1808_v24, 0.0  ;;  %v1319_v20 = vpop.f32.mrf.mxu2 }
 0x1f0   : > { %v2087_v28 = vpack.c.bf16 %v1975_v26, %v1975_v26  ;;  %v1609_v46 = vadd.f32 %v3789_v1, %v1319_v20  ;;  %v1181_v33 = vpop.f32.mrf.mxu0 }
 0x1f1   : > { %v2032_v35 = vpack.c.bf16 %v1920_v42, %v1920_v42  ;;  %v1471_v31 = vadd.f32 %v1470_v39, %v1181_v33 }
 0x1f2   : > { %2200 = vst.msk [vmem:[%s3168_s25 + $0x17c] sm:$0xf] %vm2104_vm2, %v2087_v28  ;;  %v1748_v12 = vmul.f32 %v3536_v7, %v1609_v46 }
 0x1f3   : > { %2145 = vst.msk [vmem:[%s3168_s25 + $0xa0] sm:$0xf] %vm2104_vm2, %v2032_v35  ;;  %v1693_v6 = vmul.f32 %v3536_v7, %v1471_v31 }
 0x1f4   : > { %v1864_v37 = vadd.f32 %v3547_v29, %v1748_v12  ;;  %v1620_v58 = vpop.f32.mrf.mxu3 }
 0x1f5   : > { %v1478_v40 = vpop.f32.mrf.mxu1  ;;  %v1809_v34 = vadd.f32 %v3547_v29, %v1693_v6 }
 0x1f6   : > { %v1976_v55 = vmax.f32 %v1864_v37, 0.0 }
 0x1f7   : > { %v1921_v1 = vmax.f32 %v1809_v34, 0.0  ;;  %v1321_v23 = vpop.f32.mrf.mxu2 }
 0x1f8   : > { %v2088_v43 = vpack.c.bf16 %v1976_v55, %v1976_v55  ;;  %v1611_v45 = vadd.f32 %v1610_v52, %v1321_v23  ;;  %v1184_v38 = vpop.f32.mrf.mxu0 }
 0x1f9   : > { %v2033_v59 = vpack.c.bf16 %v1921_v1, %v1921_v1  ;;  %v1474_v47 = vadd.f32 %v1473_v11, %v1184_v38 }
 0x1fa   : > { %2201 = vst.msk [vmem:[%s3168_s25 + $0x180] sm:$0xf] %vm2104_vm2, %v2088_v43  ;;  %v1749_v44 = vmul.f32 %v3536_v7, %v1611_v45 }
 0x1fb   : > { %2146 = vst.msk [vmem:[%s3168_s25 + $0xa4] sm:$0xf] %vm2104_vm2, %v2033_v59  ;;  %v1694_v22 = vmul.f32 %v3536_v7, %v1474_v47 }
 0x1fc   : > { %v1865_v51 = vadd.f32 %v3547_v29, %v1749_v44  ;;  %v1623_v21 = vpop.f32.mrf.mxu3 }
 0x1fd   : > { %v1480_v54 = vpop.f32.mrf.mxu1  ;;  %v1810_v48 = vadd.f32 %v3547_v29, %v1694_v22 }
 0x1fe   : > { %v1977_v27 = vmax.f32 %v1865_v51, 0.0 }
 0x1ff   : > { %v1922_v52 = vmax.f32 %v1810_v48, 0.0  ;;  %v1324_v60 = vpop.f32.mrf.mxu2 }
 0x200   : > { %v2089_v39 = vpack.c.bf16 %v1977_v27, %v1977_v27  ;;  %v1614_v53 = vadd.f32 %v1613_v30, %v1324_v60  ;;  %v1186_v25 = vpop.f32.mrf.mxu0 }
 0x201   : > { %v2034_v17 = vpack.c.bf16 %v1922_v52, %v1922_v52  ;;  %v1476_v62 = vadd.f32 %v1475_v56, %v1186_v25  ;;  %v3894_v25 = vld [vmem:[%s3986_s3] ss:$0 sm:$0xff] }
 0x202   : > { %2202 = vst.msk [vmem:[%s3168_s25 + $0x184] sm:$0xf] %vm2104_vm2, %v2089_v39  ;;  %v1750_v0 = vmul.f32 %v3536_v7, %v1614_v53 }
 0x203   : > { %2147 = vst.msk [vmem:[%s3168_s25 + $0xa8] sm:$0xf] %vm2104_vm2, %v2034_v17  ;;  %v1695_v57 = vmul.f32 %v3536_v7, %v1476_v62 }
 0x204   : > { %v1866_v36 = vadd.f32 %v3547_v29, %v1750_v0 }
 0x205   : > { %v1483_v3 = vpop.f32.mrf.mxu1  ;;  %v1811_v5 = vadd.f32 %v3547_v29, %v1695_v57 }
 0x206   : > { %v1978_v63 = vmax.f32 %v1866_v36, 0.0 }
 0x207   : > { %v1923_v8 = vmax.f32 %v1811_v5, 0.0  ;;  %v1326_v11 = vpop.f32.mrf.mxu2 }
 0x208   : > { %v2090_v4 = vpack.c.bf16 %v1978_v63, %v1978_v63  ;;  %v1616_v30 = vadd.f32 %v1615_v61, %v1326_v11  ;;  %v1189_v41 = vpop.f32.mrf.mxu0 }
 0x209   : > { %v2035_v14 = vpack.c.bf16 %v1923_v8, %v1923_v8  ;;  %v1479_v16 = vadd.f32 %v1478_v40, %v1189_v41  ;;  %v1625_v40 = vpop.f32.mrf.mxu3 }
 0x20a   : > { %2203 = vst.msk [vmem:[%s3168_s25 + $0x188] sm:$0xf] %vm2104_vm2, %v2090_v4  ;;  %v1751_v10 = vmul.f32 %v3536_v7, %v1616_v30 }
 0x20b   : > { %2148 = vst.msk [vmem:[%s3168_s25 + $0xac] sm:$0xf] %vm2104_vm2, %v2035_v14  ;;  %v1696_v50 = vmul.f32 %v3536_v7, %v1479_v16 }
 0x20c   : > { %v1867_v19 = vadd.f32 %v3547_v29, %v1751_v10 }
 0x20d   : > { %v1485_v9 = vpop.f32.mrf.mxu1  ;;  %v1812_v2 = vadd.f32 %v3547_v29, %v1696_v50 }
 0x20e   : > { %v1979_v18 = vmax.f32 %v1867_v19, 0.0 }
 0x20f   : > { %v1924_v15 = vmax.f32 %v1812_v2, 0.0  ;;  %v1329_v56 = vpop.f32.mrf.mxu2 }
 0x210   : > { %v2091_v24 = vpack.c.bf16 %v1979_v18, %v1979_v18  ;;  %v1619_v26 = vadd.f32 %v1618_v49, %v1329_v56  ;;  %v1191_v42 = vpop.f32.mrf.mxu0 }
 0x211   : > { %v2036_v20 = vpack.c.bf16 %v1924_v15, %v1924_v15  ;;  %v1481_v61 = vadd.f32 %v1480_v54, %v1191_v42  ;;  %v1628_v39 = vpop.f32.mrf.mxu3 }
 0x212   : > { %2204 = vst.msk [vmem:[%s3168_s25 + $0x18c] sm:$0xf] %vm2104_vm2, %v2091_v24  ;;  %v1752_v28 = vmul.f32 %v3536_v7, %v1619_v26 }
 0x213   : > { %2149 = vst.msk [vmem:[%s3168_s25 + $0xb0] sm:$0xf] %vm2104_vm2, %v2036_v20  ;;  %v1697_v46 = vmul.f32 %v3536_v7, %v1481_v61 }
 0x214   : > { %v1868_v33 = vadd.f32 %v3547_v29, %v1752_v28 }
 0x215   : > { %v1488_v35 = vpop.f32.mrf.mxu1  ;;  %v1813_v31 = vadd.f32 %v3547_v29, %v1697_v46 }
 0x216   : > { %v1980_v12 = vmax.f32 %v1868_v33, 0.0 }
 0x217   : > { %v1925_v6 = vmax.f32 %v1813_v31, 0.0  ;;  %v1331_v37 = vpop.f32.mrf.mxu2 }
 0x218   : > { %v2092_v34 = vpack.c.bf16 %v1980_v12, %v1980_v12  ;;  %v1621_v55 = vadd.f32 %v1620_v58, %v1331_v37  ;;  %v1194_v1 = vpop.f32.mrf.mxu0 }
 0x219   : > { %v2037_v23 = vpack.c.bf16 %v1925_v6, %v1925_v6  ;;  %v1484_v43 = vadd.f32 %v1483_v3, %v1194_v1  ;;  %v1630_v41 = vpop.f32.mrf.mxu3 }
 0x21a   : > { %2205 = vst.msk [vmem:[%s3168_s25 + $0x190] sm:$0xf] %vm2104_vm2, %v2092_v34  ;;  %v1753_v45 = vmul.f32 %v3536_v7, %v1621_v55 }
 0x21b   : > { %2150 = vst.msk [vmem:[%s3168_s25 + $0xb4] sm:$0xf] %vm2104_vm2, %v2037_v23  ;;  %v1698_v38 = vmul.f32 %v3536_v7, %v1484_v43  ;;  %v3885_v7 = vld [vmem:[%s3985_s2] ss:$0 sm:$0xff] }
 0x21c   : > { %v1869_v59 = vadd.f32 %v3547_v29, %v1753_v45 }
 0x21d   : > { %v1490_v47 = vpop.f32.mrf.mxu1  ;;  %v1814_v49 = vadd.f32 %v3547_v29, %v1698_v38 }
 0x21e   : > { %v1981_v44 = vmax.f32 %v1869_v59, 0.0 }
 0x21f   : > { %v1926_v22 = vmax.f32 %v1814_v49, 0.0  ;;  %v1334_v51 = vpop.f32.mrf.mxu2 }
 0x220   : > { %v2093_v54 = vpack.c.bf16 %v1981_v44, %v1981_v44  ;;  %v1624_v48 = vadd.f32 %v1623_v21, %v1334_v51  ;;  %v1196_v27 = vpop.f32.mrf.mxu0 }
 0x221   : > { %v2038_v52 = vpack.c.bf16 %v1926_v22, %v1926_v22  ;;  %v1486_v60 = vadd.f32 %v1485_v9, %v1196_v27  ;;  %v1633_v28 = vpop.f32.mrf.mxu3 }
 0x222   : > { %2206 = vst.msk [vmem:[%s3168_s25 + $0x194] sm:$0xf] %vm2104_vm2, %v2093_v54  ;;  %v1754_v53 = vmul.f32 %v3885_v7, %v1624_v48 }
 0x223   : > { %2151 = vst.msk [vmem:[%s3168_s25 + $0xb8] sm:$0xf] %vm2104_vm2, %v2038_v52  ;;  %v1699_v29 = vmul.f32 %v3885_v7, %v1486_v60 }
 0x224   : > { %v1870_v17 = vadd.f32 %v3894_v25, %v1754_v53 }
 0x225   : > { %v1493_v62 = vpop.f32.mrf.mxu1  ;;  %v1815_v0 = vadd.f32 %v3894_v25, %v1699_v29 }
 0x226   : > { %v1982_v57 = vmax.f32 %v1870_v17, 0.0 }
 0x227   : > { %v1927_v58 = vmax.f32 %v1815_v0, 0.0  ;;  %v1336_v36 = vpop.f32.mrf.mxu2 }
 0x228   : > { %v2094_v3 = vpack.c.bf16 %v1982_v57, %v1982_v57  ;;  %v1626_v5 = vadd.f32 %v1625_v40, %v1336_v36  ;;  %v1199_v63 = vpop.f32.mrf.mxu0 }
 0x229   : > { %v2039_v8 = vpack.c.bf16 %v1927_v58, %v1927_v58  ;;  %v1489_v11 = vadd.f32 %v1488_v35, %v1199_v63 }
 0x22a   : > { %2207 = vst.msk [vmem:[%s3168_s25 + $0x198] sm:$0xf] %vm2104_vm2, %v2094_v3  ;;  %v1755_v4 = vmul.f32 %v3885_v7, %v1626_v5 }
 0x22b   : > { %2152 = vst.msk [vmem:[%s3168_s25 + $0xbc] sm:$0xf] %vm2104_vm2, %v2039_v8  ;;  %v1700_v30 = vmul.f32 %v3885_v7, %v1489_v11 }
 0x22c   : > { %v1871_v14 = vadd.f32 %v3894_v25, %v1755_v4 }
 0x22d   : > { %v1495_v16 = vpop.f32.mrf.mxu1  ;;  %v1816_v10 = vadd.f32 %v3894_v25, %v1700_v30 }
 0x22e   : > { %v1983_v50 = vmax.f32 %v1871_v14, 0.0 }
 0x22f   : > { %v1928_v19 = vmax.f32 %v1816_v10, 0.0  ;;  %v1339_v9 = vpop.f32.mrf.mxu2 }
 0x230   : > { %v2095_v2 = vpack.c.bf16 %v1983_v50, %v1983_v50  ;;  %v1629_v21 = vadd.f32 %v1628_v39, %v1339_v9  ;;  %v1201_v18 = vpop.f32.mrf.mxu0 }
 0x231   : > { %v2040_v15 = vpack.c.bf16 %v1928_v19, %v1928_v19  ;;  %v1491_v56 = vadd.f32 %v1490_v47, %v1201_v18  ;;  %v1635_v47 = vpop.f32.mrf.mxu3 }
 0x232   : > { %2208 = vst.msk [vmem:[%s3168_s25 + $0x19c] sm:$0xf] %vm2104_vm2, %v2095_v2  ;;  %v1756_v24 = vmul.f32 %v3885_v7, %v1629_v21 }
 0x233   : > { %2153 = vst.msk [vmem:[%s3168_s25 + $0xc0] sm:$0xf] %vm2104_vm2, %v2040_v15  ;;  %v1701_v26 = vmul.f32 %v3885_v7, %v1491_v56 }
 0x234   : > { %v1872_v42 = vadd.f32 %v3894_v25, %v1756_v24 }
 0x235   : > { %v1498_v20 = vpop.f32.mrf.mxu1  ;;  %v1817_v61 = vadd.f32 %v3894_v25, %v1701_v26 }
 0x236   : > { %v1984_v46 = vmax.f32 %v1872_v42, 0.0 }
 0x237   : > { %v1929_v33 = vmax.f32 %v1817_v61, 0.0  ;;  %v1341_v35 = vpop.f32.mrf.mxu2 }
 0x238   : > { %v2096_v31 = vpack.c.bf16 %v1984_v46, %v1984_v46  ;;  %v1631_v12 = vadd.f32 %v1630_v41, %v1341_v35  ;;  %v1204_v6 = vpop.f32.mrf.mxu0 }
 0x239   : > { %v2041_v37 = vpack.c.bf16 %v1929_v33, %v1929_v33  ;;  %v1494_v40 = vadd.f32 %v1493_v62, %v1204_v6  ;;  %v1638_v36 = vpop.f32.mrf.mxu3 }
 0x23a   : > { %2209 = vst.msk [vmem:[%s3168_s25 + $0x1a0] sm:$0xf] %vm2104_vm2, %v2096_v31  ;;  %v1757_v34 = vmul.f32 %v3885_v7, %v1631_v12 }
 0x23b   : > { %2154 = vst.msk [vmem:[%s3168_s25 + $0xc4] sm:$0xf] %vm2104_vm2, %v2041_v37  ;;  %v1702_v55 = vmul.f32 %v3885_v7, %v1494_v40 }
 0x23c   : > { %v1873_v1 = vadd.f32 %v3894_v25, %v1757_v34 }
 0x23d   : > { %v1500_v23 = vpop.f32.mrf.mxu1  ;;  %v1818_v43 = vadd.f32 %v3894_v25, %v1702_v55 }
 0x23e   : > { %v1985_v45 = vmax.f32 %v1873_v1, 0.0 }
 0x23f   : > { %v1930_v38 = vmax.f32 %v1818_v43, 0.0  ;;  %v1344_v59 = vpop.f32.mrf.mxu2 }
 0x240   : > { %v2097_v49 = vpack.c.bf16 %v1985_v45, %v1985_v45  ;;  %v1634_v44 = vadd.f32 %v1633_v28, %v1344_v59  ;;  %v1206_v22 = vpop.f32.mrf.mxu0 }
 0x241   : > { %v2042_v51 = vpack.c.bf16 %v1930_v38, %v1930_v38  ;;  %v1496_v54 = vadd.f32 %v1495_v16, %v1206_v22  ;;  %v1640_v21 = vpop.f32.mrf.mxu3 }
 0x242   : > { %2210 = vst.msk [vmem:[%s3168_s25 + $0x1a4] sm:$0xf] %vm2104_vm2, %v2097_v49  ;;  %v1758_v48 = vmul.f32 %v3885_v7, %v1634_v44 }
 0x243   : > { %2155 = vst.msk [vmem:[%s3168_s25 + $0xc8] sm:$0xf] %vm2104_vm2, %v2042_v51  ;;  %v1703_v27 = vmul.f32 %v3885_v7, %v1496_v54 }
 0x244   : > { %v1874_v52 = vadd.f32 %v3894_v25, %v1758_v48 }
 0x245   : > { %v1503_v60 = vpop.f32.mrf.mxu1  ;;  %v1819_v39 = vadd.f32 %v3894_v25, %v1703_v27 }
 0x246   : > { %v1986_v53 = vmax.f32 %v1874_v52, 0.0 }
 0x247   : > { %v1931_v29 = vmax.f32 %v1819_v39, 0.0  ;;  %v1346_v17 = vpop.f32.mrf.mxu2 }
 0x248   : > { %v2098_v62 = vpack.c.bf16 %v1986_v53, %v1986_v53  ;;  %v1636_v0 = vadd.f32 %v1635_v47, %v1346_v17  ;;  %v1209_v57 = vpop.f32.mrf.mxu0 }
 0x249   : > { %v2043_v58 = vpack.c.bf16 %v1931_v29, %v1931_v29  ;;  %v1499_v3 = vadd.f32 %v1498_v20, %v1209_v57 }
 0x24a   : > { %2211 = vst.msk [vmem:[%s3168_s25 + $0x1a8] sm:$0xf] %vm2104_vm2, %v2098_v62  ;;  %v1759_v5 = vmul.f32 %v3885_v7, %v1636_v0 }
 0x24b   : > { %2156 = vst.msk [vmem:[%s3168_s25 + $0xcc] sm:$0xf] %vm2104_vm2, %v2043_v58  ;;  %v1704_v63 = vmul.f32 %v3885_v7, %v1499_v3 }
 0x24c   : > { %v1875_v8 = vadd.f32 %v3894_v25, %v1759_v5 }
 0x24d   : > { %v1505_v11 = vpop.f32.mrf.mxu1  ;;  %v1820_v4 = vadd.f32 %v3894_v25, %v1704_v63 }
 0x24e   : > { %v1987_v30 = vmax.f32 %v1875_v8, 0.0 }
 0x24f   : > { %v1932_v41 = vmax.f32 %v1820_v4, 0.0  ;;  %v1349_v14 = vpop.f32.mrf.mxu2 }
 0x250   : > { %v2099_v16 = vpack.c.bf16 %v1987_v30, %v1987_v30  ;;  %v1639_v10 = vadd.f32 %v1638_v36, %v1349_v14  ;;  %v1211_v50 = vpop.f32.mrf.mxu0 }
 0x251   : > { %v2044_v19 = vpack.c.bf16 %v1932_v41, %v1932_v41  ;;  %v1501_v9 = vadd.f32 %v1500_v23, %v1211_v50  ;;  %v1643_v23 = vpop.f32.mrf.mxu3 }
 0x252   : > { %2212 = vst.msk [vmem:[%s3168_s25 + $0x1ac] sm:$0xf] %vm2104_vm2, %v2099_v16  ;;  %v1760_v2 = vmul.f32 %v3885_v7, %v1639_v10 }
 0x253   : > { %2157 = vst.msk [vmem:[%s3168_s25 + $0xd0] sm:$0xf] %vm2104_vm2, %v2044_v19  ;;  %v1705_v18 = vmul.f32 %v3885_v7, %v1501_v9 }
 0x254   : > { %v1876_v15 = vadd.f32 %v3894_v25, %v1760_v2 }
 0x255   : > { %v1508_v56 = vpop.f32.mrf.mxu1  ;;  %v1821_v24 = vadd.f32 %v3894_v25, %v1705_v18 }
 0x256   : > { %v1509_v26 = vadd.f32 %v1508_v56, %v3163_v13  ;;  %v1988_v42 = vmax.f32 %v1876_v15, 0.0 }
 0x257   : > { %v1933_v20 = vmax.f32 %v1821_v24, 0.0  ;;  %v1351_v28 = vpop.f32.mrf.mxu2 }
 0x258   : > { %v1708_v61 = vmul.f32 %v3885_v7, %v1509_v26  ;;  %v2100_v46 = vpack.c.bf16 %v1988_v42, %v1988_v42  ;;  %v1641_v33 = vadd.f32 %v1640_v21, %v1351_v28  ;;  %v1214_v35 = vpop.f32.mrf.mxu0 }
 0x259   : > { %v2045_v31 = vpack.c.bf16 %v1933_v20, %v1933_v20  ;;  %v1504_v6 = vadd.f32 %v1503_v60, %v1214_v35  ;;  %v1645_v62 = vpop.f32.mrf.mxu3 }
 0x25a   : > { %v1824_v12 = vadd.f32 %v3894_v25, %v1708_v61  ;;  %2213 = vst.msk [vmem:[%s3168_s25 + $0x1b0] sm:$0xf] %vm2104_vm2, %v2100_v46  ;;  %v1761_v37 = vmul.f32 %v3885_v7, %v1641_v33 }
 0x25b   : > { %2158 = vst.msk [vmem:[%s3168_s25 + $0xd4] sm:$0xf] %vm2104_vm2, %v2045_v31  ;;  %v1706_v40 = vmul.f32 %v3885_v7, %v1504_v6 }
 0x25c   : > { %v1936_v13 = vmax.f32 %v1824_v12, 0.0  ;;  %v1877_v34 = vadd.f32 %v3894_v25, %v1761_v37 }
 0x25d   : > { %v1510_v55 = vpop.f32.mrf.mxu1  ;;  %v1822_v43 = vadd.f32 %v3894_v25, %v1706_v40 }
 0x25e   : > { %v2048_v1 = vpack.c.bf16 %v1936_v13, %v1936_v13  ;;  %v1511_v45 = vadd.f32 %v1510_v55, %v3184_v32  ;;  %v1989_v38 = vmax.f32 %v1877_v34, 0.0 }
 0x25f   : > { %v1934_v59 = vmax.f32 %v1822_v43, 0.0  ;;  %v1354_v49 = vpop.f32.mrf.mxu2 }
 0x260   : > { %2161 = vst.msk [vmem:[%s3168_s25 + $0xe0] sm:$0xf] %vm2104_vm2, %v2048_v1  ;;  %v1709_v47 = vmul.f32 %v3885_v7, %v1511_v45  ;;  %v2101_v44 = vpack.c.bf16 %v1989_v38, %v1989_v38  ;;  %v1644_v22 = vadd.f32 %v1643_v23, %v1354_v49  ;;  %v1216_v51 = vpop.f32.mrf.mxu0 }
 0x261   : > { %v2046_v54 = vpack.c.bf16 %v1934_v59, %v1934_v59  ;;  %v1506_v27 = vadd.f32 %v1505_v11, %v1216_v51 }
 0x262   : > { %v1825_v48 = vadd.f32 %v3894_v25, %v1709_v47  ;;  %2214 = vst.msk [vmem:[%s3168_s25 + $0x1b4] sm:$0xf] %vm2104_vm2, %v2101_v44  ;;  %v1762_v32 = vmul.f32 %v3885_v7, %v1644_v22 }
 0x263   : > { %2159 = vst.msk [vmem:[%s3168_s25 + $0xd8] sm:$0xf] %vm2104_vm2, %v2046_v54  ;;  %v1707_v60 = vmul.f32 %v3885_v7, %v1506_v27 }
 0x264   : > { %v1937_v52 = vmax.f32 %v1825_v48, 0.0  ;;  %v1878_v39 = vadd.f32 %v3894_v25, %v1762_v32 }
 0x265   : > { %v1823_v29 = vadd.f32 %v3894_v25, %v1707_v60 }
 0x266   : > { %v2049_v53 = vpack.c.bf16 %v1937_v52, %v1937_v52  ;;  %v1990_v17 = vmax.f32 %v1878_v39, 0.0 }
 0x267   : > { %v1935_v0 = vmax.f32 %v1823_v29, 0.0  ;;  %v1356_v57 = vpop.f32.mrf.mxu2 }
 0x268   : > { %2162 = vst.msk [vmem:[%s3168_s25 + $0xe4] sm:$0xf] %vm2104_vm2, %v2049_v53  ;;  %v2102_v58 = vpack.c.bf16 %v1990_v17, %v1990_v17  ;;  %v1646_v36 = vadd.f32 %v1645_v62, %v1356_v57 }
 0x269   : > { %v2047_v3 = vpack.c.bf16 %v1935_v0, %v1935_v0 }
 0x26a   : > { %2215 = vst.msk [vmem:[%s3168_s25 + $0x1b8] sm:$0xf] %vm2104_vm2, %v2102_v58  ;;  %v1763_v5 = vmul.f32 %v3885_v7, %v1646_v36 }
 0x26b   : > { %2160 = vst.msk [vmem:[%s3168_s25 + $0xdc] sm:$0xf] %vm2104_vm2, %v2047_v3 }
 0x26c   : > { %v1879_v63 = vadd.f32 %v3894_v25, %v1763_v5 }
 0x26e   : > { %v1991_v8 = vmax.f32 %v1879_v63, 0.0 }
 0x270   : > { %v2103_v11 = vpack.c.bf16 %v1991_v8, %v1991_v8 }
 0x272   : > { %2216 = vst.msk [vmem:[%s3168_s25 + $0x1bc] sm:$0xf] %vm2104_vm2, %v2103_v11 }
 0x273 PF: > { %s14_s15 = sadd.s32 1, %s2975_s15  }
 0x274   : > { %p11_p4 = scmp.ge.s32.totalorder %s14_s15, 16  }
 0x276   :  { %13 = sbr.rel (!%p11_p4) target bundleno = 1 (0x1), region = 66 }

</bundles_post_ra>
